<compile_context>
chip_gen: v7x
topology: tpu7x:2x2x1
jax: 0.10.0
libtpu: 0.0.40
codegen_flags: <defaults>
</compile_context>

<pallas_src>
import functools

import jax
import jax.numpy as jnp
from jax import lax
from jax.experimental import pallas as pl
from jax.experimental.pallas import tpu as pltpu

ALPHA = 0.2       # LeakyReLU negative slope
EPS = 1e-5        # BatchNorm eps
LANES = 128       # channel (lane) padding target
ALIGN = 16        # sublane alignment for bf16 tiles / DMA windows


def _lrelu(x):
    return jnp.where(x > 0, x, ALPHA * x)


def _fused_conv(src, w_ref, base, dil, K, LT, C, B):
    """One dilated-conv tile as a single lane-dense MXU matmul.

    src:   (B, >= base+(K-1)*dil+LT, C) VMEM ref view, bf16
    w_ref: (K*C, C) VMEM ref, bf16 (taps stacked along the contraction dim)
    returns: (B, LT, C) float32
    """
    taps = [src[:, base + t * dil: base + t * dil + LT, :] for t in range(K)]
    x = taps[0] if K == 1 else jnp.concatenate(taps, axis=-1)       # (B, LT, K*C)
    x = x.reshape(B * LT, K * C)
    y = jnp.dot(x, w_ref[...], preferred_element_type=jnp.float32)  # MXU, f32 accumulate
    return y.reshape(B, LT, C)


def _masked_partial_stats(h, row0, LT, C, L, st_ref):
    """Per-tile partial sum / sum-of-squares over rows whose global index < L."""
    idx = lax.broadcasted_iota(jnp.int32, (1, LT, C), 1)
    hm = jnp.where(row0 + idx < L, h, 0.0).reshape(-1, C)
    s = jnp.sum(hm, axis=0, keepdims=True)
    sq = jnp.sum(hm * hm, axis=0, keepdims=True)
    st_ref[...] = jnp.concatenate([s, sq], axis=0)[None]            # (1, 2, C)


# --------------------------- phase 1: conv_1 + skip + stats(h1) --------------------------
def _phase1_kernel(x_hbm, w1_ref, ws_ref, bs_ref,
                   h1_ref, skip_ref, st_ref,
                   xs, sem,
                   *, B, L, LT, LH, C, K, MAXPADA, PAD1, PADS):
    l = pl.program_id(0)
    nt = pl.num_programs(0)
    slot = l % 2
    row0 = pl.multiple_of(l * LT, ALIGN)

    def fetch(j, s):
        r = pl.multiple_of(j * LT, ALIGN)
        pltpu.make_async_copy(x_hbm.at[:, pl.ds(r, LH), :], xs.at[s], sem.at[s]).start()

    @pl.when(l == 0)
    def _():                 # prime the pipeline (l == 0 -> slot == 0)
        fetch(l, slot)

    @pl.when(l + 1 < nt)
    def _():                 # prefetch next tile's halo window into the other slot
        fetch(l + 1, 1 - slot)

    # wait for the current tile's halo window
    pltpu.make_async_copy(x_hbm.at[:, pl.ds(0, LH), :], xs.at[slot], sem.at[slot]).wait()
    xw = xs.at[slot]

    # conv_1 (dilation 2); conv bias dropped: training-mode BN cancels it exactly
    h1 = _fused_conv(xw, w1_ref, MAXPADA - PAD1, 2, K, LT, C, B)
    h1_ref[...] = h1.astype(h1_ref.dtype)

    # skip conv (dilation 1) + bias
    skip = _fused_conv(xw, ws_ref, MAXPADA - PADS, 1, K, LT, C, B) + bs_ref[...][None]
    skip_ref[...] = skip.astype(skip_ref.dtype)

    _masked_partial_stats(h1, row0, LT, C, L, st_ref)


# ------------------- phase 2: BN1 + LeakyReLU + conv_2 + stats(h2) -----------------------
def _phase2_kernel(h1_hbm, w2_ref, aff1_ref,
                   h2_ref, st_ref,
                   hs, sem,
                   *, B, L, LT, LH, C, K, PAD2, PAD2A):
    l = pl.program_id(0)
    nt = pl.num_programs(0)
    slot = l % 2
    row0 = pl.multiple_of(l * LT, ALIGN)

    def fetch(j, s):
        # h1's HBM buffer carries one LT tile of padding on each side of the Lp rows
        r = pl.multiple_of(LT + j * LT - PAD2A, ALIGN)
        pltpu.make_async_copy(h1_hbm.at[:, pl.ds(r, LH), :], hs.at[s], sem.at[s]).start()

    @pl.when(l == 0)
    def _():
        fetch(l, slot)

    @pl.when(l + 1 < nt)
    def _():
        fetch(l + 1, 1 - slot)

    pltpu.make_async_copy(h1_hbm.at[:, pl.ds(0, LH), :], hs.at[slot], sem.at[slot]).wait()
    hw = hs.at[slot]

    # BN1 as a global per-channel affine, then LeakyReLU; zero rows outside [0, L)
    # (this also wipes the never-written HBM pad tiles around h1 and the ragged tail).
    a = _lrelu(hw[...].astype(jnp.float32) * aff1_ref[0:1, :][None] + aff1_ref[1:2, :][None])
    idx = lax.broadcasted_iota(jnp.int32, (1, LH, C), 1)
    g = row0 - PAD2A + idx
    a = jnp.where(jnp.logical_and(g >= 0, g < L), a, 0.0)
    hw[...] = a.astype(jnp.bfloat16)          # in place: reuse the DMA buffer as conv operand

    # conv_2 (dilation 4); bias dropped (cancelled by BN2)
    h2 = _fused_conv(hw, w2_ref, PAD2A - PAD2, 4, K, LT, C, B)
    h2_ref[...] = h2.astype(h2_ref.dtype)

    _masked_partial_stats(h2, row0, LT, C, L, st_ref)


# --------------------------- phase 3: BN2 + LeakyReLU + residual -------------------------
def _phase3_kernel(h2_ref, skip_ref, aff2_ref, o_ref):
    a = _lrelu(h2_ref[...].astype(jnp.float32) * aff2_ref[0:1, :][None]
               + aff2_ref[1:2, :][None])
    o_ref[...] = a + skip_ref[...].astype(jnp.float32)


# -------------------------------------- wrapper ------------------------------------------
def _round_up(v, m):
    return (v + m - 1) // m * m


def _compiler_params(*byte_sizes, parallel=False):
    need = int(sum(byte_sizes))
    limit = int(min(48 * 2**20, max(3 * need, 8 * 2**20)))
    return pltpu.CompilerParams(
        dimension_semantics=("parallel",) if parallel else ("arbitrary",),
        vmem_limit_bytes=limit)


@functools.partial(jax.jit, static_argnames=("kernel_size", "lt"))
def dilated_res_block(x_ncl, params, kernel_size, lt=256):
    """x_ncl: (B, Cin, L) in PyTorch Conv1d layout. Returns (B, Cout, L) float32."""
    B, Cin, L = x_ncl.shape
    K = kernel_size
    Cout = params['w1'].shape[0]
    assert K % 2 == 1, "even kernel_size does not shape-check in the PyTorch module"
    assert Cin <= LANES and Cout <= LANES  # TODO(synk): add channel tiling for C > 128

    PAD1 = 2 * (K - 1) // 2          # conv_1 padding (dilation 2)
    PAD2 = 4 * (K - 1) // 2          # conv_2 padding (dilation 4)
    PADS = K // 2                    # skip conv padding (dilation 1)
    MAXPADA = _round_up(max(PAD1, PADS), ALIGN)   # aligned halo for phase 1
    PAD2A = _round_up(PAD2, ALIGN)                # aligned halo for phase 2
    C = LANES

    LT = max(ALIGN, min(_round_up(lt, ALIGN), _round_up(L, ALIGN)))
    LT = max(LT, PAD2A)              # phase-2 halo must fit inside one padding tile
    nt = -(-L // LT)
    Lp = nt * LT
    LH1 = LT + 2 * MAXPADA
    LH2 = LT + 2 * PAD2A

    f32, bf16 = jnp.float32, jnp.bfloat16

    # ---- host-side glue: channels-last + lane padding + pre-padded L axis ---------------
    # TODO(synk): keep the surrounding model channels-last (B, L, C) to drop these NCL<->BLC
    # transposes; they cost one extra HBM round-trip outside the kernels.
    x_blc = jnp.transpose(x_ncl, (0, 2, 1)).astype(bf16)           # (B, L, Cin)
    x_pre = jnp.zeros((B, Lp + 2 * MAXPADA, C), bf16)
    x_pre = x_pre.at[:, MAXPADA:MAXPADA + L, :Cin].set(x_blc)

    def stack_w(w):        # (Cout, cin, K) -> (K*C, C) bf16, taps stacked on contraction dim
        cout, cin, _ = w.shape
        wt = jnp.transpose(w, (2, 1, 0))                           # (K, cin, cout)
        wt = jnp.pad(wt, ((0, 0), (0, C - cin), (0, C - cout)))
        return wt.reshape(K * C, C).astype(bf16)

    def lane_row(v):
        return jnp.pad(v, (0, C - v.shape[0])).reshape(1, C).astype(f32)

    w1s, w2s, wss = stack_w(params['w1']), stack_w(params['w2']), stack_w(params['ws'])
    bsr = lane_row(params['bs'])

    blk = (B, LT, C)
    blk_bf16 = B * LT * C * 2
    w_bytes = K * C * C * 2

    # ---- phase 1 ------------------------------------------------------------------------
    p1 = pl.pallas_call(
        functools.partial(_phase1_kernel, B=B, L=L, LT=LT, LH=LH1, C=C, K=K,
                          MAXPADA=MAXPADA, PAD1=PAD1, PADS=PADS),
        grid=(nt,),
        in_specs=[
            pl.BlockSpec(memory_space=pl.ANY),                     # x stays in HBM (manual halo DMA)
            pl.BlockSpec((K * C, C), lambda l: (0, 0)),            # w1 (VMEM-resident)
            pl.BlockSpec((K * C, C), lambda l: (0, 0)),            # ws
            pl.BlockSpec((1, C), lambda l: (0, 0)),                # bs
        ],
        out_specs=[
            pl.BlockSpec(blk, lambda l: (0, l + 1, 0)),            # h1 (one LT pad tile each side)
            pl.BlockSpec(blk, lambda l: (0, l, 0)),                # skip
            pl.BlockSpec((1, 2, C), lambda l: (l, 0, 0)),          # partial BN1 stats
        ],
        out_shape=(jax.ShapeDtypeStruct((B, Lp + 2 * LT, C), bf16),
                   jax.ShapeDtypeStruct((B, Lp, C), bf16),
                   jax.ShapeDtypeStruct((nt, 2, C), f32)),
        scratch_shapes=[pltpu.VMEM((2, B, LH1, C), bf16),          # double-buffered halo window
                        pltpu.SemaphoreType.DMA((2,))],
        compiler_params=_compiler_params(2 * w_bytes, 6 * blk_bf16, 2 * B * LH1 * C * 2),
    )
    h1, skip, st1 = p1(x_pre, w1s, wss, bsr)

    nrm = 1.0 / float(B * L)

    def bn_affine(st, gamma, beta):
        mean = jnp.sum(st[:, 0, :], axis=0) * nrm
        var = jnp.maximum(jnp.sum(st[:, 1, :], axis=0) * nrm - mean * mean, 0.0)
        scale = lane_row(gamma)[0] * lax.rsqrt(var + EPS)
        shift = lane_row(beta)[0] - mean * scale
        return jnp.stack([scale, shift], axis=0).astype(f32)       # (2, C)

    aff1 = bn_affine(st1, params['g1'], params['be1'])

    # ---- phase 2 ------------------------------------------------------------------------
    p2 = pl.pallas_call(
        functools.partial(_phase2_kernel, B=B, L=L, LT=LT, LH=LH2, C=C, K=K,
                          PAD2=PAD2, PAD2A=PAD2A),
        grid=(nt,),
        in_specs=[
            pl.BlockSpec(memory_space=pl.ANY),                     # h1 stays in HBM
            pl.BlockSpec((K * C, C), lambda l: (0, 0)),            # w2
            pl.BlockSpec((2, C), lambda l: (0, 0)),                # BN1 scale/shift
        ],
        out_specs=[
            pl.BlockSpec(blk, lambda l: (0, l, 0)),                # h2
            pl.BlockSpec((1, 2, C), lambda l: (l, 0, 0)),          # partial BN2 stats
        ],
        out_shape=(jax.ShapeDtypeStruct((B, Lp, C), bf16),
                   jax.ShapeDtypeStruct((nt, 2, C), f32)),
        scratch_shapes=[pltpu.VMEM((2, B, LH2, C), bf16),          # double-buffered halo window
                        pltpu.SemaphoreType.DMA((2,))],
        compiler_params=_compiler_params(w_bytes, 4 * blk_bf16, 2 * B * LH2 * C * 2),
    )
    h2, st2 = p2(h1, w2s, aff1)

    aff2 = bn_affine(st2, params['g2'], params['be2'])

    # ---- phase 3 (elementwise, mem-bound: use the largest L tile that divides Lp) --------
    d = 1
    for cand in range(nt, 0, -1):
        if nt % cand == 0 and cand * LT <= 1024:
            d = cand
            break
    LT3 = d * LT
    nt3 = nt // d
    blk3 = (B, LT3, C)
    blk3_elems = B * LT3 * C

    p3 = pl.pallas_call(
        _phase3_kernel,
        grid=(nt3,),
        in_specs=[pl.BlockSpec(blk3, lambda l: (0, l, 0)),
                  pl.BlockSpec(blk3, lambda l: (0, l, 0)),
                  pl.BlockSpec((2, C), lambda l: (0, 0))],
        out_specs=pl.BlockSpec(blk3, lambda l: (0, l, 0)),
        out_shape=jax.ShapeDtypeStruct((B, Lp, C), f32),
        compiler_params=_compiler_params(2 * 8 * blk3_elems, parallel=True),
    )
    out_pad = p3(h2, skip, aff2)

    return jnp.transpose(out_pad[:, :L, :Cout], (0, 2, 1))         # back to (B, Cout, L)


# ---------------------------------------------------------------------------
# Pure-JAX reference (independent code path, full f32, biases kept).
# ---------------------------------------------------------------------------
def reference_forward(x, params, K):
    def conv(x_, w, b, pad, dil):
        y = lax.conv_general_dilated(
            x_, w, window_strides=(1,), padding=[(pad, pad)],
            rhs_dilation=(dil,), dimension_numbers=('NCH', 'OIH', 'NCH'))
        return y + b[None, :, None]

    def bn_lrelu(h, g, be):
        mean = jnp.mean(h, axis=(0, 2), keepdims=True)
        var = jnp.mean((h - mean) ** 2, axis=(0, 2), keepdims=True)
        hn = (h - mean) / jnp.sqrt(var + EPS)
        hn = hn * g[None, :, None] + be[None, :, None]
        return jnp.where(hn > 0, hn, ALPHA * hn)

    skip = conv(x, params['ws'], params['bs'], K // 2, 1)
    h = bn_lrelu(conv(x, params['w1'], params['b1'], 2 * (K - 1) // 2, 2),
                 params['g1'], params['be1'])
    h = bn_lrelu(conv(h, params['w2'], params['b2'], 4 * (K - 1) // 2, 4),
                 params['g2'], params['be2'])
    return h + skip


if __name__ == "__main__":
    # L=40 with lt=16 -> 3 L-tiles, last tile ragged (exercises the double-buffered halo DMA,
    # the prefetch guard and the stat masking).
    B, Cin, Cout, L, K = 2, 4, 8, 40, 3

    key = jax.random.PRNGKey(0)
    keys = jax.random.split(key, 11)
    params = {
        'w1': jax.random.normal(keys[0], (Cout, Cin, K), jnp.float32) * 0.3,
        'b1': jax.random.normal(keys[1], (Cout,), jnp.float32) * 0.1,
        'g1': 1.0 + 0.1 * jax.random.normal(keys[2], (Cout,), jnp.float32),
        'be1': 0.1 * jax.random.normal(keys[3], (Cout,), jnp.float32),
        'w2': jax.random.normal(keys[4], (Cout, Cout, K), jnp.float32) * 0.3,
        'b2': jax.random.normal(keys[5], (Cout,), jnp.float32) * 0.1,
        'g2': 1.0 + 0.1 * jax.random.normal(keys[6], (Cout,), jnp.float32),
        'be2': 0.1 * jax.random.normal(keys[7], (Cout,), jnp.float32),
        'ws': jax.random.normal(keys[8], (Cout, Cin, K), jnp.float32) * 0.3,
        'bs': jax.random.normal(keys[9], (Cout,), jnp.float32) * 0.1,
    }
    x = jax.random.normal(keys[10], (B, Cin, L), jnp.float32)

    out = jax.block_until_ready(dilated_res_block(x, params, kernel_size=K, lt=16))
    ref = jax.block_until_ready(reference_forward(x, params, K))

    assert out.shape == (B, Cout, L), out.shape
    err = jnp.max(jnp.abs(out - ref))
    # bf16 matmul inputs / bf16 intermediates (f32 accumulate + f32 stats) vs f32 reference
    assert jnp.allclose(out, ref, rtol=5e-2, atol=5e-2), f"max abs err {err}"

    print("KERNEL_OK")
</pallas_src>

<mosaic_0001>
module attributes {stable_mosaic.version = 11 : i64} {
  func.func @_phase1_kernel(%arg0: i32, %arg1: memref<2x80x128xbf16, #tpu.memory_space<any>>, %arg2: memref<384x128xbf16, #tpu.memory_space<vmem>>, %arg3: memref<384x128xbf16, #tpu.memory_space<vmem>>, %arg4: memref<1x128xf32, #tpu.memory_space<vmem>>, %arg5: memref<2x16x128xbf16, #tpu.memory_space<vmem>>, %arg6: memref<2x16x128xbf16, #tpu.memory_space<vmem>>, %arg7: memref<1x2x128xf32, #tpu.memory_space<vmem>>, %arg8: memref<2x2x48x128xbf16, #tpu.memory_space<vmem>>, %arg9: memref<2x!tpu.dma_semaphore, #tpu.memory_space<semaphore_mem>>) attributes {dimension_semantics = [#tpu.dimension_semantics<arbitrary>], iteration_bounds = array<i64: 3>, scalar_prefetch = 0 : i64, scratch_operands = 2 : i64, tpu.core_type = #tpu.core_type<tc>, window_params = [{}, {pipeline_mode = #tpu.pipeline_mode<synchronous>, transform_indices = @transform_1, window_bounds = array<i64: 384, 128>}, {pipeline_mode = #tpu.pipeline_mode<synchronous>, transform_indices = @transform_2, window_bounds = array<i64: 384, 128>}, {pipeline_mode = #tpu.pipeline_mode<synchronous>, transform_indices = @transform_3, window_bounds = array<i64: 1, 128>}, {transform_indices = @transform_4, window_bounds = array<i64: 2, 16, 128>}, {transform_indices = @transform_5, window_bounds = array<i64: 2, 16, 128>}, {transform_indices = @transform_6, window_bounds = array<i64: 1, 2, 128>}]} {
    %c2_i32 = arith.constant 2 : i32
    %c0_i32 = arith.constant 0 : i32
    %0 = arith.cmpi eq, %c2_i32, %c0_i32 : i32
    %c1_i32 = arith.constant 1 : i32
    %1 = arith.select %0, %c1_i32, %c2_i32 : i32
    %2 = arith.remsi %arg0, %1 : i32
    %c0_i32_0 = arith.constant 0 : i32
    %3 = arith.cmpi ne, %2, %c0_i32_0 : i32
    %c0_i32_1 = arith.constant 0 : i32
    %4 = arith.cmpi slt, %2, %c0_i32_1 : i32
    %c0_i32_2 = arith.constant 0 : i32
    %5 = arith.cmpi slt, %1, %c0_i32_2 : i32
    %6 = arith.xori %4, %5 : i1
    %7 = arith.andi %6, %3 : i1
    %8 = arith.addi %2, %1 : i32
    %9 = arith.select %7, %8, %2 : i32
    %c16_i32 = arith.constant 16 : i32
    %10 = arith.muli %arg0, %c16_i32 : i32
    %11 = tpu.assume_multiple %10, 16 : i32
    %c0_i32_3 = arith.constant 0 : i32
    %12 = arith.cmpi eq, %arg0, %c0_i32_3 : i32
    %13 = arith.extui %12 : i1 to i32
    %c0_i32_4 = arith.constant 0 : i32
    %14 = arith.cmpi ne, %13, %c0_i32_4 : i32
    scf.if %14 {
      %c16_i32_62 = arith.constant 16 : i32
      %78 = arith.muli %arg0, %c16_i32_62 : i32
      %79 = tpu.assume_multiple %78, 16 : i32
      %c0_i32_63 = arith.constant 0 : i32
      %c0_i32_64 = arith.constant 0 : i32
      %80 = tpu.memref_slice %arg1[%c0_i32_63, %79, %c0_i32_64] : memref<2x80x128xbf16, #tpu.memory_space<any>> -> memref<2x48x128xbf16, #tpu.memory_space<any>>
      %c0_i32_65 = arith.constant 0 : i32
      %c0_i32_66 = arith.constant 0 : i32
      %c0_i32_67 = arith.constant 0 : i32
      %81 = tpu.memref_slice %arg8[%9, %c0_i32_65, %c0_i32_66, %c0_i32_67] : memref<2x2x48x128xbf16, #tpu.memory_space<vmem>> -> memref<1x2x48x128xbf16, #tpu.memory_space<vmem>>
      %82 = tpu.memref_squeeze %81 : memref<1x2x48x128xbf16, #tpu.memory_space<vmem>> -> memref<2x48x128xbf16, #tpu.memory_space<vmem>>
      %83 = tpu.memref_slice %arg9[%9] : memref<2x!tpu.dma_semaphore, #tpu.memory_space<semaphore_mem>> -> memref<1x!tpu.dma_semaphore, #tpu.memory_space<semaphore_mem>>
      %84 = tpu.memref_squeeze %83 : memref<1x!tpu.dma_semaphore, #tpu.memory_space<semaphore_mem>> -> memref<!tpu.dma_semaphore, #tpu.memory_space<semaphore_mem>>
      tpu.enqueue_dma source(%80 : memref<2x48x128xbf16, #tpu.memory_space<any>>) target(%82 : memref<2x48x128xbf16, #tpu.memory_space<vmem>>) target_semaphore(%84 : memref<!tpu.dma_semaphore, #tpu.memory_space<semaphore_mem>>)
    } else {
    }
    %c1_i32_5 = arith.constant 1 : i32
    %15 = arith.addi %arg0, %c1_i32_5 : i32
    %c3_i32 = arith.constant 3 : i32
    %16 = arith.cmpi slt, %15, %c3_i32 : i32
    %17 = arith.extui %16 : i1 to i32
    %c0_i32_6 = arith.constant 0 : i32
    %18 = arith.cmpi ne, %17, %c0_i32_6 : i32
    scf.if %18 {
      %c1_i32_62 = arith.constant 1 : i32
      %78 = arith.addi %arg0, %c1_i32_62 : i32
      %c1_i32_63 = arith.constant 1 : i32
      %79 = arith.subi %c1_i32_63, %9 : i32
      %c16_i32_64 = arith.constant 16 : i32
      %80 = arith.muli %78, %c16_i32_64 : i32
      %81 = tpu.assume_multiple %80, 16 : i32
      %c0_i32_65 = arith.constant 0 : i32
      %c0_i32_66 = arith.constant 0 : i32
      %82 = tpu.memref_slice %arg1[%c0_i32_65, %81, %c0_i32_66] : memref<2x80x128xbf16, #tpu.memory_space<any>> -> memref<2x48x128xbf16, #tpu.memory_space<any>>
      %c0_i32_67 = arith.constant 0 : i32
      %c0_i32_68 = arith.constant 0 : i32
      %c0_i32_69 = arith.constant 0 : i32
      %83 = tpu.memref_slice %arg8[%79, %c0_i32_67, %c0_i32_68, %c0_i32_69] : memref<2x2x48x128xbf16, #tpu.memory_space<vmem>> -> memref<1x2x48x128xbf16, #tpu.memory_space<vmem>>
      %84 = tpu.memref_squeeze %83 : memref<1x2x48x128xbf16, #tpu.memory_space<vmem>> -> memref<2x48x128xbf16, #tpu.memory_space<vmem>>
      %85 = tpu.memref_slice %arg9[%79] : memref<2x!tpu.dma_semaphore, #tpu.memory_space<semaphore_mem>> -> memref<1x!tpu.dma_semaphore, #tpu.memory_space<semaphore_mem>>
      %86 = tpu.memref_squeeze %85 : memref<1x!tpu.dma_semaphore, #tpu.memory_space<semaphore_mem>> -> memref<!tpu.dma_semaphore, #tpu.memory_space<semaphore_mem>>
      tpu.enqueue_dma source(%82 : memref<2x48x128xbf16, #tpu.memory_space<any>>) target(%84 : memref<2x48x128xbf16, #tpu.memory_space<vmem>>) target_semaphore(%86 : memref<!tpu.dma_semaphore, #tpu.memory_space<semaphore_mem>>)
    } else {
    }
    %c0_i32_7 = arith.constant 0 : i32
    %c0_i32_8 = arith.constant 0 : i32
    %c0_i32_9 = arith.constant 0 : i32
    %19 = tpu.memref_slice %arg1[%c0_i32_7, %c0_i32_8, %c0_i32_9] : memref<2x80x128xbf16, #tpu.memory_space<any>> -> memref<2x48x128xbf16, #tpu.memory_space<any>>
    %c0_i32_10 = arith.constant 0 : i32
    %c0_i32_11 = arith.constant 0 : i32
    %c0_i32_12 = arith.constant 0 : i32
    %20 = tpu.memref_slice %arg8[%9, %c0_i32_10, %c0_i32_11, %c0_i32_12] : memref<2x2x48x128xbf16, #tpu.memory_space<vmem>> -> memref<1x2x48x128xbf16, #tpu.memory_space<vmem>>
    %21 = tpu.memref_squeeze %20 : memref<1x2x48x128xbf16, #tpu.memory_space<vmem>> -> memref<2x48x128xbf16, #tpu.memory_space<vmem>>
    %22 = tpu.memref_slice %arg9[%9] : memref<2x!tpu.dma_semaphore, #tpu.memory_space<semaphore_mem>> -> memref<1x!tpu.dma_semaphore, #tpu.memory_space<semaphore_mem>>
    %23 = tpu.memref_squeeze %22 : memref<1x!tpu.dma_semaphore, #tpu.memory_space<semaphore_mem>> -> memref<!tpu.dma_semaphore, #tpu.memory_space<semaphore_mem>>
    tpu.wait_dma2 semaphore(%23 : memref<!tpu.dma_semaphore, #tpu.memory_space<semaphore_mem>>) src(%19 : memref<2x48x128xbf16, #tpu.memory_space<any>>) dst(%21 : memref<2x48x128xbf16, #tpu.memory_space<vmem>>)
    %c0_i32_13 = arith.constant 0 : i32
    %c0_i32_14 = arith.constant 0 : i32
    %c0_i32_15 = arith.constant 0 : i32
    %24 = tpu.memref_slice %arg8[%9, %c0_i32_13, %c0_i32_14, %c0_i32_15] : memref<2x2x48x128xbf16, #tpu.memory_space<vmem>> -> memref<1x2x48x128xbf16, #tpu.memory_space<vmem>>
    %25 = tpu.memref_squeeze %24 : memref<1x2x48x128xbf16, #tpu.memory_space<vmem>> -> memref<2x48x128xbf16, #tpu.memory_space<vmem>>
    %c0 = arith.constant 0 : index
    %c14 = arith.constant 14 : index
    %c0_16 = arith.constant 0 : index
    %26 = vector.load %25[%c0, %c14, %c0_16] : memref<2x48x128xbf16, #tpu.memory_space<vmem>>, vector<2x16x128xbf16>
    %c0_i32_17 = arith.constant 0 : i32
    %c0_i32_18 = arith.constant 0 : i32
    %c0_i32_19 = arith.constant 0 : i32
    %27 = tpu.memref_slice %arg8[%9, %c0_i32_17, %c0_i32_18, %c0_i32_19] : memref<2x2x48x128xbf16, #tpu.memory_space<vmem>> -> memref<1x2x48x128xbf16, #tpu.memory_space<vmem>>
    %28 = tpu.memref_squeeze %27 : memref<1x2x48x128xbf16, #tpu.memory_space<vmem>> -> memref<2x48x128xbf16, #tpu.memory_space<vmem>>
    %c0_20 = arith.constant 0 : index
    %c16 = arith.constant 16 : index
    %c0_21 = arith.constant 0 : index
    %29 = vector.load %28[%c0_20, %c16, %c0_21] : memref<2x48x128xbf16, #tpu.memory_space<vmem>>, vector<2x16x128xbf16>
    %c0_i32_22 = arith.constant 0 : i32
    %c0_i32_23 = arith.constant 0 : i32
    %c0_i32_24 = arith.constant 0 : i32
    %30 = tpu.memref_slice %arg8[%9, %c0_i32_22, %c0_i32_23, %c0_i32_24] : memref<2x2x48x128xbf16, #tpu.memory_space<vmem>> -> memref<1x2x48x128xbf16, #tpu.memory_space<vmem>>
    %31 = tpu.memref_squeeze %30 : memref<1x2x48x128xbf16, #tpu.memory_space<vmem>> -> memref<2x48x128xbf16, #tpu.memory_space<vmem>>
    %c0_25 = arith.constant 0 : index
    %c18 = arith.constant 18 : index
    %c0_26 = arith.constant 0 : index
    %32 = vector.load %31[%c0_25, %c18, %c0_26] : memref<2x48x128xbf16, #tpu.memory_space<vmem>>, vector<2x16x128xbf16>
    %33 = tpu.concatenate %26, %29, %32 in 2 : vector<2x16x128xbf16>, vector<2x16x128xbf16>, vector<2x16x128xbf16> -> vector<2x16x384xbf16>
    %34 = vector.shape_cast %33 : vector<2x16x384xbf16> to vector<32x384xbf16>
    %c0_27 = arith.constant 0 : index
    %c0_28 = arith.constant 0 : index
    %35 = vector.load %arg2[%c0_27, %c0_28] : memref<384x128xbf16, #tpu.memory_space<vmem>>, vector<384x128xbf16>
    %cst = arith.constant dense<0.000000e+00> : vector<32x128xf32>
    %36 = tpu.matmul %34, %35, %cst {dimension_numbers = #tpu.dot_dimension_numbers<[1], [0], [0], [1], [0, 0, 1, 1], [], []>} : vector<32x384xbf16>, vector<384x128xbf16>, vector<32x128xf32> -> vector<32x128xf32>
    %37 = vector.shape_cast %36 : vector<32x128xf32> to vector<2x16x128xf32>
    %38 = arith.truncf %37 : vector<2x16x128xf32> to vector<2x16x128xbf16>
    %c0_29 = arith.constant 0 : index
    %c0_30 = arith.constant 0 : index
    %c0_31 = arith.constant 0 : index
    %39 = vector.load %arg5[%c0_29, %c0_30, %c0_31] : memref<2x16x128xbf16, #tpu.memory_space<vmem>>, vector<2x16x128xbf16>
    tpu.vector_store %arg5[%c0_29, %c0_30, %c0_31], %38 {strides = array<i32>} : memref<2x16x128xbf16, #tpu.memory_space<vmem>>, vector<2x16x128xbf16>,
    %c0_i32_32 = arith.constant 0 : i32
    %c0_i32_33 = arith.constant 0 : i32
    %c0_i32_34 = arith.constant 0 : i32
    %40 = tpu.memref_slice %arg8[%9, %c0_i32_32, %c0_i32_33, %c0_i32_34] : memref<2x2x48x128xbf16, #tpu.memory_space<vmem>> -> memref<1x2x48x128xbf16, #tpu.memory_space<vmem>>
    %41 = tpu.memref_squeeze %40 : memref<1x2x48x128xbf16, #tpu.memory_space<vmem>> -> memref<2x48x128xbf16, #tpu.memory_space<vmem>>
    %c0_35 = arith.constant 0 : index
    %c15 = arith.constant 15 : index
    %c0_36 = arith.constant 0 : index
    %42 = vector.load %41[%c0_35, %c15, %c0_36] : memref<2x48x128xbf16, #tpu.memory_space<vmem>>, vector<2x16x128xbf16>
    %c0_i32_37 = arith.constant 0 : i32
    %c0_i32_38 = arith.constant 0 : i32
    %c0_i32_39 = arith.constant 0 : i32
    %43 = tpu.memref_slice %arg8[%9, %c0_i32_37, %c0_i32_38, %c0_i32_39] : memref<2x2x48x128xbf16, #tpu.memory_space<vmem>> -> memref<1x2x48x128xbf16, #tpu.memory_space<vmem>>
    %44 = tpu.memref_squeeze %43 : memref<1x2x48x128xbf16, #tpu.memory_space<vmem>> -> memref<2x48x128xbf16, #tpu.memory_space<vmem>>
    %c0_40 = arith.constant 0 : index
    %c16_41 = arith.constant 16 : index
    %c0_42 = arith.constant 0 : index
    %45 = vector.load %44[%c0_40, %c16_41, %c0_42] : memref<2x48x128xbf16, #tpu.memory_space<vmem>>, vector<2x16x128xbf16>
    %c0_i32_43 = arith.constant 0 : i32
    %c0_i32_44 = arith.constant 0 : i32
    %c0_i32_45 = arith.constant 0 : i32
    %46 = tpu.memref_slice %arg8[%9, %c0_i32_43, %c0_i32_44, %c0_i32_45] : memref<2x2x48x128xbf16, #tpu.memory_space<vmem>> -> memref<1x2x48x128xbf16, #tpu.memory_space<vmem>>
    %47 = tpu.memref_squeeze %46 : memref<1x2x48x128xbf16, #tpu.memory_space<vmem>> -> memref<2x48x128xbf16, #tpu.memory_space<vmem>>
    %c0_46 = arith.constant 0 : index
    %c17 = arith.constant 17 : index
    %c0_47 = arith.constant 0 : index
    %48 = vector.load %47[%c0_46, %c17, %c0_47] : memref<2x48x128xbf16, #tpu.memory_space<vmem>>, vector<2x16x128xbf16>
    %49 = tpu.concatenate %42, %45, %48 in 2 : vector<2x16x128xbf16>, vector<2x16x128xbf16>, vector<2x16x128xbf16> -> vector<2x16x384xbf16>
    %50 = vector.shape_cast %49 : vector<2x16x384xbf16> to vector<32x384xbf16>
    %c0_48 = arith.constant 0 : index
    %c0_49 = arith.constant 0 : index
    %51 = vector.load %arg3[%c0_48, %c0_49] : memref<384x128xbf16, #tpu.memory_space<vmem>>, vector<384x128xbf16>
    %cst_50 = arith.constant dense<0.000000e+00> : vector<32x128xf32>
    %52 = tpu.matmul %50, %51, %cst_50 {dimension_numbers = #tpu.dot_dimension_numbers<[1], [0], [0], [1], [0, 0, 1, 1], [], []>} : vector<32x384xbf16>, vector<384x128xbf16>, vector<32x128xf32> -> vector<32x128xf32>
    %53 = vector.shape_cast %52 : vector<32x128xf32> to vector<2x16x128xf32>
    %c0_51 = arith.constant 0 : index
    %c0_52 = arith.constant 0 : index
    %54 = vector.load %arg4[%c0_51, %c0_52] : memref<1x128xf32, #tpu.memory_space<vmem>>, vector<1x128xf32>
    %55 = vector.shape_cast %54 : vector<1x128xf32> to vector<1x1x128xf32>
    %56 = vector.broadcast %55 : vector<1x1x128xf32> to vector<2x16x128xf32>
    %57 = arith.addf %53, %56 : vector<2x16x128xf32>
    %58 = arith.truncf %57 : vector<2x16x128xf32> to vector<2x16x128xbf16>
    %c0_53 = arith.constant 0 : index
    %c0_54 = arith.constant 0 : index
    %c0_55 = arith.constant 0 : index
    %59 = vector.load %arg6[%c0_53, %c0_54, %c0_55] : memref<2x16x128xbf16, #tpu.memory_space<vmem>>, vector<2x16x128xbf16>
    tpu.vector_store %arg6[%c0_53, %c0_54, %c0_55], %58 {strides = array<i32>} : memref<2x16x128xbf16, #tpu.memory_space<vmem>>, vector<2x16x128xbf16>,
    %60 = tpu.iota {dimensions = array<i32: 1>} : vector<1x16x128xi32>
    %61 = vector.broadcast %11 : i32 to vector<1x16x128xi32>
    %62 = arith.addi %61, %60 : vector<1x16x128xi32>
    %c40_i32 = arith.constant 40 : i32
    %63 = vector.broadcast %c40_i32 : i32 to vector<1x16x128xi32>
    %64 = arith.cmpi slt, %62, %63 : vector<1x16x128xi32>
    %cst_56 = arith.constant 0.000000e+00 : f32
    %65 = vector.shape_cast %64 : vector<1x16x128xi1> to vector<1x16x128xi1>
    %66 = vector.broadcast %65 : vector<1x16x128xi1> to vector<2x16x128xi1>
    %67 = vector.broadcast %cst_56 : f32 to vector<2x16x128xf32>
    %68 = arith.select %66, %37, %67 : vector<2x16x128xi1>, vector<2x16x128xf32>
    %69 = vector.shape_cast %68 : vector<2x16x128xf32> to vector<32x128xf32>
    %cst_57 = arith.constant dense<0.000000e+00> : vector<128xf32>
    %70 = vector.multi_reduction <add>, %69, %cst_57 [0] : vector<32x128xf32> to vector<128xf32>
    %71 = vector.shape_cast %70 : vector<128xf32> to vector<1x128xf32>
    %72 = arith.mulf %69, %69 : vector<32x128xf32>
    %cst_58 = arith.constant dense<0.000000e+00> : vector<128xf32>
    %73 = vector.multi_reduction <add>, %72, %cst_58 [0] : vector<32x128xf32> to vector<128xf32>
    %74 = vector.shape_cast %73 : vector<128xf32> to vector<1x128xf32>
    %75 = tpu.concatenate %71, %74 in 0 : vector<1x128xf32>, vector<1x128xf32> -> vector<2x128xf32>
    %76 = vector.shape_cast %75 : vector<2x128xf32> to vector<1x2x128xf32>
    %c0_59 = arith.constant 0 : index
    %c0_60 = arith.constant 0 : index
    %c0_61 = arith.constant 0 : index
    %77 = vector.load %arg7[%c0_59, %c0_60, %c0_61] : memref<1x2x128xf32, #tpu.memory_space<vmem>>, vector<1x2x128xf32>
    tpu.vector_store %arg7[%c0_59, %c0_60, %c0_61], %76 {strides = array<i32>} : memref<1x2x128xf32, #tpu.memory_space<vmem>>, vector<1x2x128xf32>,
    return
  }
  func.func @transform_1(%arg0: i32) -> (i32, i32) {
    %c0_i32 = arith.constant 0 : i32
    %c0_i32_0 = arith.constant 0 : i32
    %c0_i32_1 = arith.constant 0 : i32
    return %c0_i32, %c0_i32_0 : i32, i32
  }
  func.func @transform_2(%arg0: i32) -> (i32, i32) {
    %c0_i32 = arith.constant 0 : i32
    %c0_i32_0 = arith.constant 0 : i32
    %c0_i32_1 = arith.constant 0 : i32
    return %c0_i32, %c0_i32_0 : i32, i32
  }
  func.func @transform_3(%arg0: i32) -> (i32, i32) {
    %c0_i32 = arith.constant 0 : i32
    %c0_i32_0 = arith.constant 0 : i32
    %c0_i32_1 = arith.constant 0 : i32
    return %c0_i32, %c0_i32_0 : i32, i32
  }
  func.func @transform_4(%arg0: i32) -> (i32, i32, i32) {
    %c1_i32 = arith.constant 1 : i32
    %0 = arith.addi %arg0, %c1_i32 : i32
    %c0_i32 = arith.constant 0 : i32
    %c0_i32_0 = arith.constant 0 : i32
    %c0_i32_1 = arith.constant 0 : i32
    return %c0_i32, %0, %c0_i32_0 : i32, i32, i32
  }
  func.func @transform_5(%arg0: i32) -> (i32, i32, i32) {
    %c0_i32 = arith.constant 0 : i32
    %c0_i32_0 = arith.constant 0 : i32
    %c0_i32_1 = arith.constant 0 : i32
    return %c0_i32, %arg0, %c0_i32_0 : i32, i32, i32
  }
  func.func @transform_6(%arg0: i32) -> (i32, i32, i32) {
    %c0_i32 = arith.constant 0 : i32
    %c0_i32_0 = arith.constant 0 : i32
    %c0_i32_1 = arith.constant 0 : i32
    return %arg0, %c0_i32, %c0_i32_0 : i32, i32, i32
  }
}

module attributes {stable_mosaic.version = 11 : i64} {
  func.func @_phase3_kernel(%arg0: i32, %arg1: memref<2x48x128xbf16, #tpu.memory_space<vmem>>, %arg2: memref<2x48x128xbf16, #tpu.memory_space<vmem>>, %arg3: memref<2x128xf32, #tpu.memory_space<vmem>>, %arg4: memref<2x48x128xf32, #tpu.memory_space<vmem>>) attributes {dimension_semantics = [#tpu.dimension_semantics<parallel>], iteration_bounds = array<i64: 1>, scalar_prefetch = 0 : i64, scratch_operands = 0 : i64, tpu.core_type = #tpu.core_type<tc>, window_params = [{transform_indices = @transform_0, window_bounds = array<i64: 2, 48, 128>}, {transform_indices = @transform_1, window_bounds = array<i64: 2, 48, 128>}, {pipeline_mode = #tpu.pipeline_mode<synchronous>, transform_indices = @transform_2, window_bounds = array<i64: 2, 128>}, {transform_indices = @transform_3, window_bounds = array<i64: 2, 48, 128>}]} {
    %c0 = arith.constant 0 : index
    %c0_0 = arith.constant 0 : index
    %c0_1 = arith.constant 0 : index
    %0 = vector.load %arg1[%c0, %c0_0, %c0_1] : memref<2x48x128xbf16, #tpu.memory_space<vmem>>, vector<2x48x128xbf16>
    %1 = arith.extf %0 : vector<2x48x128xbf16> to vector<2x48x128xf32>
    %c0_2 = arith.constant 0 : index
    %c0_3 = arith.constant 0 : index
    %2 = vector.load %arg3[%c0_2, %c0_3] : memref<2x128xf32, #tpu.memory_space<vmem>>, vector<1x128xf32>
    %3 = vector.shape_cast %2 : vector<1x128xf32> to vector<1x1x128xf32>
    %4 = vector.broadcast %3 : vector<1x1x128xf32> to vector<2x48x128xf32>
    %5 = arith.mulf %1, %4 : vector<2x48x128xf32>
    %c1 = arith.constant 1 : index
    %c0_4 = arith.constant 0 : index
    %6 = vector.load %arg3[%c1, %c0_4] : memref<2x128xf32, #tpu.memory_space<vmem>>, vector<1x128xf32>
    %7 = vector.shape_cast %6 : vector<1x128xf32> to vector<1x1x128xf32>
    %8 = vector.broadcast %7 : vector<1x1x128xf32> to vector<2x48x128xf32>
    %9 = arith.addf %5, %8 : vector<2x48x128xf32>
    %cst = arith.constant 0.000000e+00 : f32
    %10 = vector.broadcast %cst : f32 to vector<2x48x128xf32>
    %11 = arith.cmpf ogt, %9, %10 : vector<2x48x128xf32>
    %cst_5 = arith.constant 2.000000e-01 : f32
    %12 = vector.broadcast %cst_5 : f32 to vector<2x48x128xf32>
    %13 = arith.mulf %12, %9 : vector<2x48x128xf32>
    %14 = arith.select %11, %9, %13 : vector<2x48x128xi1>, vector<2x48x128xf32>
    %c0_6 = arith.constant 0 : index
    %c0_7 = arith.constant 0 : index
    %c0_8 = arith.constant 0 : index
    %15 = vector.load %arg2[%c0_6, %c0_7, %c0_8] : memref<2x48x128xbf16, #tpu.memory_space<vmem>>, vector<2x48x128xbf16>
    %16 = arith.extf %15 : vector<2x48x128xbf16> to vector<2x48x128xf32>
    %17 = arith.addf %14, %16 : vector<2x48x128xf32>
    %c0_9 = arith.constant 0 : index
    %c0_10 = arith.constant 0 : index
    %c0_11 = arith.constant 0 : index
    %18 = vector.load %arg4[%c0_9, %c0_10, %c0_11] : memref<2x48x128xf32, #tpu.memory_space<vmem>>, vector<2x48x128xf32>
    tpu.vector_store %arg4[%c0_9, %c0_10, %c0_11], %17 {strides = array<i32>} : memref<2x48x128xf32, #tpu.memory_space<vmem>>, vector<2x48x128xf32>,
    return
  }
  func.func @transform_0(%arg0: i32) -> (i32, i32, i32) {
    %c0_i32 = arith.constant 0 : i32
    %c0_i32_0 = arith.constant 0 : i32
    %c0_i32_1 = arith.constant 0 : i32
    return %c0_i32, %arg0, %c0_i32_0 : i32, i32, i32
  }
  func.func @transform_1(%arg0: i32) -> (i32, i32, i32) {
    %c0_i32 = arith.constant 0 : i32
    %c0_i32_0 = arith.constant 0 : i32
    %c0_i32_1 = arith.constant 0 : i32
    return %c0_i32, %arg0, %c0_i32_0 : i32, i32, i32
  }
  func.func @transform_2(%arg0: i32) -> (i32, i32) {
    %c0_i32 = arith.constant 0 : i32
    %c0_i32_0 = arith.constant 0 : i32
    %c0_i32_1 = arith.constant 0 : i32
    return %c0_i32, %c0_i32_0 : i32, i32
  }
  func.func @transform_3(%arg0: i32) -> (i32, i32, i32) {
    %c0_i32 = arith.constant 0 : i32
    %c0_i32_0 = arith.constant 0 : i32
    %c0_i32_1 = arith.constant 0 : i32
    return %c0_i32, %arg0, %c0_i32_0 : i32, i32, i32
  }
}

module attributes {stable_mosaic.version = 11 : i64} {
  func.func @_phase2_kernel(%arg0: i32, %arg1: memref<2x80x128xbf16, #tpu.memory_space<any>>, %arg2: memref<384x128xbf16, #tpu.memory_space<vmem>>, %arg3: memref<2x128xf32, #tpu.memory_space<vmem>>, %arg4: memref<2x16x128xbf16, #tpu.memory_space<vmem>>, %arg5: memref<1x2x128xf32, #tpu.memory_space<vmem>>, %arg6: memref<2x2x48x128xbf16, #tpu.memory_space<vmem>>, %arg7: memref<2x!tpu.dma_semaphore, #tpu.memory_space<semaphore_mem>>) attributes {dimension_semantics = [#tpu.dimension_semantics<arbitrary>], iteration_bounds = array<i64: 3>, scalar_prefetch = 0 : i64, scratch_operands = 2 : i64, tpu.core_type = #tpu.core_type<tc>, window_params = [{}, {pipeline_mode = #tpu.pipeline_mode<synchronous>, transform_indices = @transform_1, window_bounds = array<i64: 384, 128>}, {pipeline_mode = #tpu.pipeline_mode<synchronous>, transform_indices = @transform_2, window_bounds = array<i64: 2, 128>}, {transform_indices = @transform_3, window_bounds = array<i64: 2, 16, 128>}, {transform_indices = @transform_4, window_bounds = array<i64: 1, 2, 128>}]} {
    %c2_i32 = arith.constant 2 : i32
    %c0_i32 = arith.constant 0 : i32
    %0 = arith.cmpi eq, %c2_i32, %c0_i32 : i32
    %c1_i32 = arith.constant 1 : i32
    %1 = arith.select %0, %c1_i32, %c2_i32 : i32
    %2 = arith.remsi %arg0, %1 : i32
    %c0_i32_0 = arith.constant 0 : i32
    %3 = arith.cmpi ne, %2, %c0_i32_0 : i32
    %c0_i32_1 = arith.constant 0 : i32
    %4 = arith.cmpi slt, %2, %c0_i32_1 : i32
    %c0_i32_2 = arith.constant 0 : i32
    %5 = arith.cmpi slt, %1, %c0_i32_2 : i32
    %6 = arith.xori %4, %5 : i1
    %7 = arith.andi %6, %3 : i1
    %8 = arith.addi %2, %1 : i32
    %9 = arith.select %7, %8, %2 : i32
    %c16_i32 = arith.constant 16 : i32
    %10 = arith.muli %arg0, %c16_i32 : i32
    %11 = tpu.assume_multiple %10, 16 : i32
    %c0_i32_3 = arith.constant 0 : i32
    %12 = arith.cmpi eq, %arg0, %c0_i32_3 : i32
    %13 = arith.extui %12 : i1 to i32
    %c0_i32_4 = arith.constant 0 : i32
    %14 = arith.cmpi ne, %13, %c0_i32_4 : i32
    scf.if %14 {
      %c16_i32_53 = arith.constant 16 : i32
      %93 = arith.muli %arg0, %c16_i32_53 : i32
      %c16_i32_54 = arith.constant 16 : i32
      %94 = arith.addi %c16_i32_54, %93 : i32
      %c16_i32_55 = arith.constant 16 : i32
      %95 = arith.subi %94, %c16_i32_55 : i32
      %96 = tpu.assume_multiple %95, 16 : i32
      %c0_i32_56 = arith.constant 0 : i32
      %c0_i32_57 = arith.constant 0 : i32
      %97 = tpu.memref_slice %arg1[%c0_i32_56, %96, %c0_i32_57] : memref<2x80x128xbf16, #tpu.memory_space<any>> -> memref<2x48x128xbf16, #tpu.memory_space<any>>
      %c0_i32_58 = arith.constant 0 : i32
      %c0_i32_59 = arith.constant 0 : i32
      %c0_i32_60 = arith.constant 0 : i32
      %98 = tpu.memref_slice %arg6[%9, %c0_i32_58, %c0_i32_59, %c0_i32_60] : memref<2x2x48x128xbf16, #tpu.memory_space<vmem>> -> memref<1x2x48x128xbf16, #tpu.memory_space<vmem>>
      %99 = tpu.memref_squeeze %98 : memref<1x2x48x128xbf16, #tpu.memory_space<vmem>> -> memref<2x48x128xbf16, #tpu.memory_space<vmem>>
      %100 = tpu.memref_slice %arg7[%9] : memref<2x!tpu.dma_semaphore, #tpu.memory_space<semaphore_mem>> -> memref<1x!tpu.dma_semaphore, #tpu.memory_space<semaphore_mem>>
      %101 = tpu.memref_squeeze %100 : memref<1x!tpu.dma_semaphore, #tpu.memory_space<semaphore_mem>> -> memref<!tpu.dma_semaphore, #tpu.memory_space<semaphore_mem>>
      tpu.enqueue_dma source(%97 : memref<2x48x128xbf16, #tpu.memory_space<any>>) target(%99 : memref<2x48x128xbf16, #tpu.memory_space<vmem>>) target_semaphore(%101 : memref<!tpu.dma_semaphore, #tpu.memory_space<semaphore_mem>>)
    } else {
    }
    %c1_i32_5 = arith.constant 1 : i32
    %15 = arith.addi %arg0, %c1_i32_5 : i32
    %c3_i32 = arith.constant 3 : i32
    %16 = arith.cmpi slt, %15, %c3_i32 : i32
    %17 = arith.extui %16 : i1 to i32
    %c0_i32_6 = arith.constant 0 : i32
    %18 = arith.cmpi ne, %17, %c0_i32_6 : i32
    scf.if %18 {
      %c1_i32_53 = arith.constant 1 : i32
      %93 = arith.addi %arg0, %c1_i32_53 : i32
      %c1_i32_54 = arith.constant 1 : i32
      %94 = arith.subi %c1_i32_54, %9 : i32
      %c16_i32_55 = arith.constant 16 : i32
      %95 = arith.muli %93, %c16_i32_55 : i32
      %c16_i32_56 = arith.constant 16 : i32
      %96 = arith.addi %c16_i32_56, %95 : i32
      %c16_i32_57 = arith.constant 16 : i32
      %97 = arith.subi %96, %c16_i32_57 : i32
      %98 = tpu.assume_multiple %97, 16 : i32
      %c0_i32_58 = arith.constant 0 : i32
      %c0_i32_59 = arith.constant 0 : i32
      %99 = tpu.memref_slice %arg1[%c0_i32_58, %98, %c0_i32_59] : memref<2x80x128xbf16, #tpu.memory_space<any>> -> memref<2x48x128xbf16, #tpu.memory_space<any>>
      %c0_i32_60 = arith.constant 0 : i32
      %c0_i32_61 = arith.constant 0 : i32
      %c0_i32_62 = arith.constant 0 : i32
      %100 = tpu.memref_slice %arg6[%94, %c0_i32_60, %c0_i32_61, %c0_i32_62] : memref<2x2x48x128xbf16, #tpu.memory_space<vmem>> -> memref<1x2x48x128xbf16, #tpu.memory_space<vmem>>
      %101 = tpu.memref_squeeze %100 : memref<1x2x48x128xbf16, #tpu.memory_space<vmem>> -> memref<2x48x128xbf16, #tpu.memory_space<vmem>>
      %102 = tpu.memref_slice %arg7[%94] : memref<2x!tpu.dma_semaphore, #tpu.memory_space<semaphore_mem>> -> memref<1x!tpu.dma_semaphore, #tpu.memory_space<semaphore_mem>>
      %103 = tpu.memref_squeeze %102 : memref<1x!tpu.dma_semaphore, #tpu.memory_space<semaphore_mem>> -> memref<!tpu.dma_semaphore, #tpu.memory_space<semaphore_mem>>
      tpu.enqueue_dma source(%99 : memref<2x48x128xbf16, #tpu.memory_space<any>>) target(%101 : memref<2x48x128xbf16, #tpu.memory_space<vmem>>) target_semaphore(%103 : memref<!tpu.dma_semaphore, #tpu.memory_space<semaphore_mem>>)
    } else {
    }
    %c0_i32_7 = arith.constant 0 : i32
    %c0_i32_8 = arith.constant 0 : i32
    %c0_i32_9 = arith.constant 0 : i32
    %19 = tpu.memref_slice %arg1[%c0_i32_7, %c0_i32_8, %c0_i32_9] : memref<2x80x128xbf16, #tpu.memory_space<any>> -> memref<2x48x128xbf16, #tpu.memory_space<any>>
    %c0_i32_10 = arith.constant 0 : i32
    %c0_i32_11 = arith.constant 0 : i32
    %c0_i32_12 = arith.constant 0 : i32
    %20 = tpu.memref_slice %arg6[%9, %c0_i32_10, %c0_i32_11, %c0_i32_12] : memref<2x2x48x128xbf16, #tpu.memory_space<vmem>> -> memref<1x2x48x128xbf16, #tpu.memory_space<vmem>>
    %21 = tpu.memref_squeeze %20 : memref<1x2x48x128xbf16, #tpu.memory_space<vmem>> -> memref<2x48x128xbf16, #tpu.memory_space<vmem>>
    %22 = tpu.memref_slice %arg7[%9] : memref<2x!tpu.dma_semaphore, #tpu.memory_space<semaphore_mem>> -> memref<1x!tpu.dma_semaphore, #tpu.memory_space<semaphore_mem>>
    %23 = tpu.memref_squeeze %22 : memref<1x!tpu.dma_semaphore, #tpu.memory_space<semaphore_mem>> -> memref<!tpu.dma_semaphore, #tpu.memory_space<semaphore_mem>>
    tpu.wait_dma2 semaphore(%23 : memref<!tpu.dma_semaphore, #tpu.memory_space<semaphore_mem>>) src(%19 : memref<2x48x128xbf16, #tpu.memory_space<any>>) dst(%21 : memref<2x48x128xbf16, #tpu.memory_space<vmem>>)
    %24 = arith.index_cast %9 : i32 to index
    %c0 = arith.constant 0 : index
    %c0_13 = arith.constant 0 : index
    %c0_14 = arith.constant 0 : index
    %25 = vector.load %arg6[%24, %c0, %c0_13, %c0_14] : memref<2x2x48x128xbf16, #tpu.memory_space<vmem>>, vector<1x2x48x128xbf16>
    %26 = vector.shape_cast %25 : vector<1x2x48x128xbf16> to vector<2x48x128xbf16>
    %27 = arith.extf %26 : vector<2x48x128xbf16> to vector<2x48x128xf32>
    %c0_15 = arith.constant 0 : index
    %c0_16 = arith.constant 0 : index
    %28 = vector.load %arg3[%c0_15, %c0_16] : memref<2x128xf32, #tpu.memory_space<vmem>>, vector<1x128xf32>
    %29 = vector.shape_cast %28 : vector<1x128xf32> to vector<1x1x128xf32>
    %30 = vector.broadcast %29 : vector<1x1x128xf32> to vector<2x48x128xf32>
    %31 = arith.mulf %27, %30 : vector<2x48x128xf32>
    %c1 = arith.constant 1 : index
    %c0_17 = arith.constant 0 : index
    %32 = vector.load %arg3[%c1, %c0_17] : memref<2x128xf32, #tpu.memory_space<vmem>>, vector<1x128xf32>
    %33 = vector.shape_cast %32 : vector<1x128xf32> to vector<1x1x128xf32>
    %34 = vector.broadcast %33 : vector<1x1x128xf32> to vector<2x48x128xf32>
    %35 = arith.addf %31, %34 : vector<2x48x128xf32>
    %cst = arith.constant 0.000000e+00 : f32
    %36 = vector.broadcast %cst : f32 to vector<2x48x128xf32>
    %37 = arith.cmpf ogt, %35, %36 : vector<2x48x128xf32>
    %cst_18 = arith.constant 2.000000e-01 : f32
    %38 = vector.broadcast %cst_18 : f32 to vector<2x48x128xf32>
    %39 = arith.mulf %38, %35 : vector<2x48x128xf32>
    %40 = arith.select %37, %35, %39 : vector<2x48x128xi1>, vector<2x48x128xf32>
    %41 = tpu.iota {dimensions = array<i32: 1>} : vector<1x48x128xi32>
    %c16_i32_19 = arith.constant 16 : i32
    %42 = arith.subi %11, %c16_i32_19 : i32
    %43 = vector.broadcast %42 : i32 to vector<1x48x128xi32>
    %44 = arith.addi %43, %41 : vector<1x48x128xi32>
    %c0_i32_20 = arith.constant 0 : i32
    %45 = vector.broadcast %c0_i32_20 : i32 to vector<1x48x128xi32>
    %46 = arith.cmpi sge, %44, %45 : vector<1x48x128xi32>
    %c40_i32 = arith.constant 40 : i32
    %47 = vector.broadcast %c40_i32 : i32 to vector<1x48x128xi32>
    %48 = arith.cmpi slt, %44, %47 : vector<1x48x128xi32>
    %49 = arith.andi %46, %48 : vector<1x48x128xi1>
    %cst_21 = arith.constant 0.000000e+00 : f32
    %50 = vector.shape_cast %49 : vector<1x48x128xi1> to vector<1x48x128xi1>
    %51 = vector.broadcast %50 : vector<1x48x128xi1> to vector<2x48x128xi1>
    %52 = vector.broadcast %cst_21 : f32 to vector<2x48x128xf32>
    %53 = arith.select %51, %40, %52 : vector<2x48x128xi1>, vector<2x48x128xf32>
    %54 = arith.truncf %53 : vector<2x48x128xf32> to vector<2x48x128xbf16>
    %55 = arith.index_cast %9 : i32 to index
    %c0_22 = arith.constant 0 : index
    %c0_23 = arith.constant 0 : index
    %c0_24 = arith.constant 0 : index
    %56 = vector.load %arg6[%55, %c0_22, %c0_23, %c0_24] : memref<2x2x48x128xbf16, #tpu.memory_space<vmem>>, vector<1x2x48x128xbf16>
    %57 = vector.shape_cast %56 : vector<1x2x48x128xbf16> to vector<2x48x128xbf16>
    %58 = vector.shape_cast %54 : vector<2x48x128xbf16> to vector<1x2x48x128xbf16>
    tpu.vector_store %arg6[%55, %c0_22, %c0_23, %c0_24], %58 {strides = array<i32>} : memref<2x2x48x128xbf16, #tpu.memory_space<vmem>>, vector<1x2x48x128xbf16>,
    %c0_i32_25 = arith.constant 0 : i32
    %c0_i32_26 = arith.constant 0 : i32
    %c0_i32_27 = arith.constant 0 : i32
    %59 = tpu.memref_slice %arg6[%9, %c0_i32_25, %c0_i32_26, %c0_i32_27] : memref<2x2x48x128xbf16, #tpu.memory_space<vmem>> -> memref<1x2x48x128xbf16, #tpu.memory_space<vmem>>
    %60 = tpu.memref_squeeze %59 : memref<1x2x48x128xbf16, #tpu.memory_space<vmem>> -> memref<2x48x128xbf16, #tpu.memory_space<vmem>>
    %c0_28 = arith.constant 0 : index
    %c12 = arith.constant 12 : index
    %c0_29 = arith.constant 0 : index
    %61 = vector.load %60[%c0_28, %c12, %c0_29] : memref<2x48x128xbf16, #tpu.memory_space<vmem>>, vector<2x16x128xbf16>
    %c0_i32_30 = arith.constant 0 : i32
    %c0_i32_31 = arith.constant 0 : i32
    %c0_i32_32 = arith.constant 0 : i32
    %62 = tpu.memref_slice %arg6[%9, %c0_i32_30, %c0_i32_31, %c0_i32_32] : memref<2x2x48x128xbf16, #tpu.memory_space<vmem>> -> memref<1x2x48x128xbf16, #tpu.memory_space<vmem>>
    %63 = tpu.memref_squeeze %62 : memref<1x2x48x128xbf16, #tpu.memory_space<vmem>> -> memref<2x48x128xbf16, #tpu.memory_space<vmem>>
    %c0_33 = arith.constant 0 : index
    %c16 = arith.constant 16 : index
    %c0_34 = arith.constant 0 : index
    %64 = vector.load %63[%c0_33, %c16, %c0_34] : memref<2x48x128xbf16, #tpu.memory_space<vmem>>, vector<2x16x128xbf16>
    %c0_i32_35 = arith.constant 0 : i32
    %c0_i32_36 = arith.constant 0 : i32
    %c0_i32_37 = arith.constant 0 : i32
    %65 = tpu.memref_slice %arg6[%9, %c0_i32_35, %c0_i32_36, %c0_i32_37] : memref<2x2x48x128xbf16, #tpu.memory_space<vmem>> -> memref<1x2x48x128xbf16, #tpu.memory_space<vmem>>
    %66 = tpu.memref_squeeze %65 : memref<1x2x48x128xbf16, #tpu.memory_space<vmem>> -> memref<2x48x128xbf16, #tpu.memory_space<vmem>>
    %c0_38 = arith.constant 0 : index
    %c20 = arith.constant 20 : index
    %c0_39 = arith.constant 0 : index
    %67 = vector.load %66[%c0_38, %c20, %c0_39] : memref<2x48x128xbf16, #tpu.memory_space<vmem>>, vector<2x16x128xbf16>
    %68 = tpu.concatenate %61, %64, %67 in 2 : vector<2x16x128xbf16>, vector<2x16x128xbf16>, vector<2x16x128xbf16> -> vector<2x16x384xbf16>
    %69 = vector.shape_cast %68 : vector<2x16x384xbf16> to vector<32x384xbf16>
    %c0_40 = arith.constant 0 : index
    %c0_41 = arith.constant 0 : index
    %70 = vector.load %arg2[%c0_40, %c0_41] : memref<384x128xbf16, #tpu.memory_space<vmem>>, vector<384x128xbf16>
    %cst_42 = arith.constant dense<0.000000e+00> : vector<32x128xf32>
    %71 = tpu.matmul %69, %70, %cst_42 {dimension_numbers = #tpu.dot_dimension_numbers<[1], [0], [0], [1], [0, 0, 1, 1], [], []>} : vector<32x384xbf16>, vector<384x128xbf16>, vector<32x128xf32> -> vector<32x128xf32>
    %72 = vector.shape_cast %71 : vector<32x128xf32> to vector<2x16x128xf32>
    %73 = arith.truncf %72 : vector<2x16x128xf32> to vector<2x16x128xbf16>
    %c0_43 = arith.constant 0 : index
    %c0_44 = arith.constant 0 : index
    %c0_45 = arith.constant 0 : index
    %74 = vector.load %arg4[%c0_43, %c0_44, %c0_45] : memref<2x16x128xbf16, #tpu.memory_space<vmem>>, vector<2x16x128xbf16>
    tpu.vector_store %arg4[%c0_43, %c0_44, %c0_45], %73 {strides = array<i32>} : memref<2x16x128xbf16, #tpu.memory_space<vmem>>, vector<2x16x128xbf16>,
    %75 = tpu.iota {dimensions = array<i32: 1>} : vector<1x16x128xi32>
    %76 = vector.broadcast %11 : i32 to vector<1x16x128xi32>
    %77 = arith.addi %76, %75 : vector<1x16x128xi32>
    %c40_i32_46 = arith.constant 40 : i32
    %78 = vector.broadcast %c40_i32_46 : i32 to vector<1x16x128xi32>
    %79 = arith.cmpi slt, %77, %78 : vector<1x16x128xi32>
    %cst_47 = arith.constant 0.000000e+00 : f32
    %80 = vector.shape_cast %79 : vector<1x16x128xi1> to vector<1x16x128xi1>
    %81 = vector.broadcast %80 : vector<1x16x128xi1> to vector<2x16x128xi1>
    %82 = vector.broadcast %cst_47 : f32 to vector<2x16x128xf32>
    %83 = arith.select %81, %72, %82 : vector<2x16x128xi1>, vector<2x16x128xf32>
    %84 = vector.shape_cast %83 : vector<2x16x128xf32> to vector<32x128xf32>
    %cst_48 = arith.constant dense<0.000000e+00> : vector<128xf32>
    %85 = vector.multi_reduction <add>, %84, %cst_48 [0] : vector<32x128xf32> to vector<128xf32>
    %86 = vector.shape_cast %85 : vector<128xf32> to vector<1x128xf32>
    %87 = arith.mulf %84, %84 : vector<32x128xf32>
    %cst_49 = arith.constant dense<0.000000e+00> : vector<128xf32>
    %88 = vector.multi_reduction <add>, %87, %cst_49 [0] : vector<32x128xf32> to vector<128xf32>
    %89 = vector.shape_cast %88 : vector<128xf32> to vector<1x128xf32>
    %90 = tpu.concatenate %86, %89 in 0 : vector<1x128xf32>, vector<1x128xf32> -> vector<2x128xf32>
    %91 = vector.shape_cast %90 : vector<2x128xf32> to vector<1x2x128xf32>
    %c0_50 = arith.constant 0 : index
    %c0_51 = arith.constant 0 : index
    %c0_52 = arith.constant 0 : index
    %92 = vector.load %arg5[%c0_50, %c0_51, %c0_52] : memref<1x2x128xf32, #tpu.memory_space<vmem>>, vector<1x2x128xf32>
    tpu.vector_store %arg5[%c0_50, %c0_51, %c0_52], %91 {strides = array<i32>} : memref<1x2x128xf32, #tpu.memory_space<vmem>>, vector<1x2x128xf32>,
    return
  }
  func.func @transform_1(%arg0: i32) -> (i32, i32) {
    %c0_i32 = arith.constant 0 : i32
    %c0_i32_0 = arith.constant 0 : i32
    %c0_i32_1 = arith.constant 0 : i32
    return %c0_i32, %c0_i32_0 : i32, i32
  }
  func.func @transform_2(%arg0: i32) -> (i32, i32) {
    %c0_i32 = arith.constant 0 : i32
    %c0_i32_0 = arith.constant 0 : i32
    %c0_i32_1 = arith.constant 0 : i32
    return %c0_i32, %c0_i32_0 : i32, i32
  }
  func.func @transform_3(%arg0: i32) -> (i32, i32, i32) {
    %c0_i32 = arith.constant 0 : i32
    %c0_i32_0 = arith.constant 0 : i32
    %c0_i32_1 = arith.constant 0 : i32
    return %c0_i32, %arg0, %c0_i32_0 : i32, i32, i32
  }
  func.func @transform_4(%arg0: i32) -> (i32, i32, i32) {
    %c0_i32 = arith.constant 0 : i32
    %c0_i32_0 = arith.constant 0 : i32
    %c0_i32_1 = arith.constant 0 : i32
    return %arg0, %c0_i32, %c0_i32_0 : i32, i32, i32
  }
}

</mosaic_0001>

<bundles_post_ra>
// kernel: dilated_res_block.5
= control target key start
LH: loop header
LB: loop body
LE: loop exit
PB: predicated region body
PF: predicated region fallthrough
CT: control target
= control target key end

     0   :  { %s346_s0 = inlined_call_operand.vmem [shape: bf16[2,48,128], index: 0, kind: input, shape index: {}]   ;;  %s347_s1 = inlined_call_operand.vmem [shape: bf16[2,48,128], index: 1, kind: input, shape index: {}]   ;;  %s348_s2 = inlined_call_operand.vmem [shape: f32[2,128], index: 2, kind: input, shape index: {}]   ;;  %s349_s3 = inlined_call_operand.vmem [shape: f32[2,48,128], index: 3, kind: output, shape index: {}]  }
   0x1   :  { %v163_v0 = vld [vmem:[%s346_s0] sm:$0xff]   ;;  %v210_v5 = vld [vmem:[%s346_s0 + $0x8] sm:$0xff]   ;;  %v211_v12 = vld [vmem:[%s346_s0 + $0x10] sm:$0xff]  }
   0x2   :  { %v246_v1 = vld [vmem:[%s348_s2] ss:$0 sm:$0xff]  ;;  %v164_v2 = vunpack.c.l.bf16 %v163_v0  ;;  %v165_v4 = vunpack.c.h.bf16 %v163_v0  ;;  %v215_v6 = vld [vmem:[%s347_s1 + $0x8] sm:$0xff]   ;;  %v260_v7 = vld [vmem:[%s348_s2 + $0x1] ss:$0 sm:$0xff]  ;;  %v168_v10 = vunpack.c.l.bf16 %v210_v5  ;;  %v169_v16 = vunpack.c.h.bf16 %v210_v5 }
   0x3   :  { %v187_v3 = vld [vmem:[%s347_s1] sm:$0xff]   ;;  %v192_v11 = vunpack.c.l.bf16 %v215_v6  ;;  %v216_v13 = vld [vmem:[%s347_s1 + $0x10] sm:$0xff]   ;;  %v193_v17 = vunpack.c.h.bf16 %v215_v6  ;;  %v212_v18 = vld [vmem:[%s346_s0 + $0x18] sm:$0xff]   ;;  %v172_v20 = vunpack.c.l.bf16 %v211_v12  ;;  %v173_v22 = vunpack.c.h.bf16 %v211_v12 }
   0x4   :  { %v188_v8 = vunpack.c.l.bf16 %v187_v3  ;;  %v189_v9 = vunpack.c.h.bf16 %v187_v3  ;;  %v43_v14 = vmul.f32 %v164_v2, %v246_v1  ;;  %v44_v15 = vmul.f32 %v165_v4, %v246_v1  ;;  %v217_v43 = vld [vmem:[%s347_s1 + $0x18] sm:$0xff]   ;;  %v213_v49 = vld [vmem:[%s346_s0 + $0x20] sm:$0xff]   ;;  %v214_v54 = vld [vmem:[%s346_s0 + $0x28] sm:$0xff]  }
   0x5   :  { %v45_v19 = vmul.f32 %v168_v10, %v246_v1  ;;  %v196_v21 = vunpack.c.l.bf16 %v216_v13  ;;  %v46_v25 = vmul.f32 %v169_v16, %v246_v1  ;;  %v197_v26 = vunpack.c.h.bf16 %v216_v13  ;;  %v218_v62 = vld [vmem:[%s347_s1 + $0x20] sm:$0xff]   ;;  %v219_v10 = vld [vmem:[%s347_s1 + $0x28] sm:$0xff]  }
   0x6   :  { %v60_v23 = vadd.f32 %v260_v7, %v43_v14  ;;  %v61_v24 = vadd.f32 %v260_v7, %v44_v15  ;;  %v47_v28 = vmul.f32 %v172_v20, %v246_v1  ;;  %v48_v29 = vmul.f32 %v173_v22, %v246_v1 }
   0x7   :  { %v62_v27 = vadd.f32 %v260_v7, %v45_v19  ;;  %v176_v30 = vunpack.c.l.bf16 %v212_v18  ;;  %v63_v34 = vadd.f32 %v260_v7, %v46_v25  ;;  %v200_v52 = vunpack.c.l.bf16 %v217_v43 }
   0x8   :  { %vm72_vm0 = vcmp.gt.f32.partialorder %v60_v23, 0.0  ;;  %v84_v31 = vmul.f32 0.2, %v60_v23  ;;  %vm73_vm1 = vcmp.gt.f32.partialorder %v61_v24, 0.0  ;;  %v85_v32 = vmul.f32 0.2, %v61_v24 }
   0x9   :  { %vm74_vm2 = vcmp.gt.f32.partialorder %v62_v27, 0.0  ;;  %v86_v33 = vmul.f32 0.2, %v62_v27  ;;  %v64_v35 = vadd.f32 %v260_v7, %v47_v28  ;;  %v65_v38 = vadd.f32 %v260_v7, %v48_v29 }
   0xa   :  { %v96_v36 = vsel %vm72_vm0, %v60_v23, %v84_v31  ;;  %v97_v37 = vsel %vm73_vm1, %v61_v24, %v85_v32  ;;  %v49_v39 = vmul.f32 %v176_v30, %v246_v1  ;;  %vm75_vm3 = vcmp.gt.f32.partialorder %v63_v34, 0.0 }
   0xb   :  { %v132_v40 = vadd.f32 %v188_v8, %v96_v36  ;;  %v133_v41 = vadd.f32 %v189_v9, %v97_v37  ;;  %v98_v42 = vsel %vm74_vm2, %v62_v27, %v86_v33  ;;  %v87_v45 = vmul.f32 0.2, %v63_v34 }
   0xc   :  { %v134_v44 = vadd.f32 %v192_v11, %v98_v42  ;;  %vm76_vm4 = vcmp.gt.f32.partialorder %v64_v35, 0.0  ;;  %v88_v46 = vmul.f32 0.2, %v64_v35  ;;  %vm77_vm5 = vcmp.gt.f32.partialorder %v65_v38, 0.0 }
   0xd   :  { %144 = vst [vmem:[%s349_s3] sm:$0xff] %v132_v40  ;;  %145 = vst [vmem:[%s349_s3 + $0x8] sm:$0xff] %v133_v41  ;;  %v89_v47 = vmul.f32 0.2, %v65_v38  ;;  %v66_v48 = vadd.f32 %v260_v7, %v49_v39  ;;  %v99_v50 = vsel %vm75_vm3, %v63_v34, %v87_v45  ;;  %v177_v53 = vunpack.c.h.bf16 %v212_v18 }
   0xe   :  { %146 = vst [vmem:[%s349_s3 + $0x10] sm:$0xff] %v134_v44  ;;  %v100_v51 = vsel %vm76_vm4, %v64_v35, %v88_v46  ;;  %v135_v55 = vadd.f32 %v193_v17, %v99_v50  ;;  %v180_v61 = vunpack.c.l.bf16 %v213_v49  ;;  %v181_v63 = vunpack.c.h.bf16 %v213_v49 }
   0xf   :  { %v136_v56 = vadd.f32 %v196_v21, %v100_v51  ;;  %v101_v57 = vsel %vm77_vm5, %v65_v38, %v89_v47  ;;  %vm78_vm6 = vcmp.gt.f32.partialorder %v66_v48, 0.0  ;;  %v90_v59 = vmul.f32 0.2, %v66_v48 }
  0x10   :  { %v137_v58 = vadd.f32 %v197_v26, %v101_v57  ;;  %v50_v60 = vmul.f32 %v177_v53, %v246_v1  ;;  %147 = vst [vmem:[%s349_s3 + $0x18] sm:$0xff] %v135_v55  ;;  %v184_v0 = vunpack.c.l.bf16 %v214_v54  ;;  %v201_v4 = vunpack.c.h.bf16 %v217_v43 }
  0x11   :  { %148 = vst [vmem:[%s349_s3 + $0x20] sm:$0xff] %v136_v56  ;;  %v102_v2 = vsel %vm78_vm6, %v66_v48, %v90_v59  ;;  %v51_v5 = vmul.f32 %v180_v61, %v246_v1  ;;  %v52_v8 = vmul.f32 %v181_v63, %v246_v1  ;;  %v185_v11 = vunpack.c.h.bf16 %v214_v54 }
  0x12   :  { %149 = vst [vmem:[%s349_s3 + $0x28] sm:$0xff] %v137_v58  ;;  %v67_v3 = vadd.f32 %v260_v7, %v50_v60  ;;  %v138_v6 = vadd.f32 %v200_v52, %v102_v2  ;;  %v53_v9 = vmul.f32 %v184_v0, %v246_v1  ;;  %v204_v14 = vunpack.c.l.bf16 %v218_v62 }
  0x13   :  { %v68_v13 = vadd.f32 %v260_v7, %v51_v5  ;;  %v69_v15 = vadd.f32 %v260_v7, %v52_v8  ;;  %v205_v16 = vunpack.c.h.bf16 %v218_v62  ;;  %v54_v18 = vmul.f32 %v185_v11, %v246_v1 }
  0x14   :  { %vm79_vm7 = vcmp.gt.f32.partialorder %v67_v3, 0.0  ;;  %v91_v12 = vmul.f32 0.2, %v67_v3  ;;  %150 = vst [vmem:[%s349_s3 + $0x30] sm:$0xff] %v138_v6  ;;  %v70_v17 = vadd.f32 %v260_v7, %v53_v9  ;;  %v208_v21 = vunpack.c.l.bf16 %v219_v10 }
  0x15   :  { %vm80_vm8 = vcmp.gt.f32.partialorder %v68_v13, 0.0  ;;  %v92_v20 = vmul.f32 0.2, %v68_v13  ;;  %vm81_vm9 = vcmp.gt.f32.partialorder %v69_v15, 0.0  ;;  %v93_v23 = vmul.f32 0.2, %v69_v15 }
  0x16   :  { %v103_v19 = vsel %vm79_vm7, %v67_v3, %v91_v12  ;;  %vm82_vm10 = vcmp.gt.f32.partialorder %v70_v17, 0.0  ;;  %v94_v25 = vmul.f32 0.2, %v70_v17  ;;  %v71_v26 = vadd.f32 %v260_v7, %v54_v18 }
  0x17   :  { %v139_v22 = vadd.f32 %v201_v4, %v103_v19  ;;  %v104_v24 = vsel %vm80_vm8, %v68_v13, %v92_v20  ;;  %v105_v28 = vsel %vm81_vm9, %v69_v15, %v93_v23  ;;  %v209_v29 = vunpack.c.h.bf16 %v219_v10 }
  0x18   :  { %v140_v27 = vadd.f32 %v204_v14, %v104_v24  ;;  %v141_v1 = vadd.f32 %v205_v16, %v105_v28  ;;  %v106_v30 = vsel %vm82_vm10, %v70_v17, %v94_v25  ;;  %vm83_vm11 = vcmp.gt.f32.partialorder %v71_v26, 0.0 }
  0x19   :  { %151 = vst [vmem:[%s349_s3 + $0x38] sm:$0xff] %v139_v22  ;;  %v95_v31 = vmul.f32 0.2, %v71_v26  ;;  %v142_v32 = vadd.f32 %v208_v21, %v106_v30 }
  0x1a   :  { %152 = vst [vmem:[%s349_s3 + $0x40] sm:$0xff] %v140_v27  ;;  %153 = vst [vmem:[%s349_s3 + $0x48] sm:$0xff] %v141_v1 }
  0x1b   :  { %v107_v7 = vsel %vm83_vm11, %v71_v26, %v95_v31  ;;  %154 = vst [vmem:[%s349_s3 + $0x50] sm:$0xff] %v142_v32 }
  0x1c   :  { %v143_v33 = vadd.f32 %v209_v29, %v107_v7 }
  0x1e   :  { %155 = vst [vmem:[%s349_s3 + $0x58] sm:$0xff] %v143_v33 }

// kernel: dilated_res_block.4
= control target key start
LH: loop header
LB: loop body
LE: loop exit
PB: predicated region body
PF: predicated region fallthrough
CT: control target
= control target key end

     0   :  { %s1287_s15 = smov 0   ;;  %s1289_s16 = smov 0   ;;  %s1641_s0 = inlined_call_operand.vmem [shape: bf16[2,80,128], index: 0, kind: input, shape index: {}]   ;;  %s1642_s1 = inlined_call_operand.vmem [shape: bf16[384,128], index: 1, kind: input, shape index: {}]   ;;  %s1643_s2 = inlined_call_operand.vmem [shape: f32[2,128], index: 2, kind: input, shape index: {}]   ;;  %s1644_s3 = inlined_call_operand.vmem [shape: bf16[2,48,128], index: 3, kind: output, shape index: {0}]   ;;  %s1645_s4 = inlined_call_operand.vmem [shape: f32[3,2,128], index: 4, kind: output, shape index: {1}]  }
   0x1   :  { %s1291_s17 = smov 0  }
   0x2 LB: > { %s1298_s18 = sadd.s32 4294967295, %s1260_s17   ;;  %s1300_s19 = sadd.s32 1, %s1260_s17   ;;  %s1260_s17 = sphi %s1291_s17, %s1664_s17   ;;  %s1256_s16 = sphi %s1289_s16, %s1663_s16   ;;  %s1252_s15 = sphi %s1287_s15, %s1662_s15  }
   0x3   : > { %s61_s20 = ssub.s32 %s1260_s17, %s1300_s19  ;;  %s64_s21 = sadd.s32 1, %s1256_s16 }
   0x4   : > { %p62_p0 = scmp.eq.s32.totalorder %s61_s20, 0  ;;  %p74_p1 = scmp.ne.s32.totalorder %s1256_s16, %s1252_s15 }
   0x5   : > { %p75_p2 = scmp.eq.s32.totalorder %s1298_s18, 2  ;;  %p1048_p3 = scmp.ge.s32.totalorder %s1260_s17, 1 }
   0x6   : > { %s1307_s22 = scalar_select %p62_p0, %s1256_s16, %s64_s21  }
   0x7   : > { %p1309_p4 = por %p75_p2, %p74_p1  ;;  %p131_p5 = scmp.lt.s32.totalorder %s1260_s17, 4 }
   0x9   : > { %p132_p6 = pnand %p1048_p3, %p131_p5 }
   0xa   : > { %s144_s24 = sand.u32 (!%p132_p6), 1, %s1252_s15   ;;  %p154_p7 = scmp.lt.s32.totalorder (!%p132_p6), %s1298_s18, 2 }
   0xb   : > { %135 = sbr.rel (%p132_p6) target bundleno = 341 (0x155), region = 28  ;;  %s1049_s25 = sshll.u32 (!%p132_p6), %s144_s24, 4 }
   0xc   : > { %p159_p8 = scmp.lt.s32.totalorder (!%p132_p6), %s1298_s18, 0  ;;  %s160_s26 = ssub.s32 (!%p132_p6), 0, %s1298_s18 }
   0xd   : > { %s1051_s28 = smin.u32 (!%p132_p6), %s1298_s18, %s160_s26  ;;  %s1319_s29 = sshll.u32 (!%p132_p6), %s1298_s18, 4 }
   0xe   : > { %s162_s5 = sand.u32 (!%p132_p6), 1, %s1051_s28   ;;  %s1328_s11 = scalar_lea.vmem (!%p132_p6), [#allocation4], %s1049_s25 }
   0xf   : > { %s163_s9 = ssub.s32 (!%p132_p6), 0, %s162_s5  ;;  %p1055_p10 = scmp.ne.s32.totalorder (!%p132_p6), %s1298_s18, 0 }
  0x12   : > { %s155_s27 = scalar_select %p154_p7, %s1298_s18, 2 }
  0x13   : > { %s1666_s9 = smov (!%p159_p8, %s163_s9), %s162_s5  ;;  %175 = sbr.rel (%p1055_p10) target bundleno = 30 (0x1e), region = 32 }
  0x14   : > { %s1050_s30 = sshll.u32 %s155_s27, 1  ;;  %p1053_p9 = scmp.lt.s32.totalorder %s1666_s9, 0 }
  0x15   : > { %s1324_s8 = scalar_lea.vmem %s1645_s4, %s1050_s30  ;;  %s169_s10 = sadd.s32 2, %s1666_s9 }
  0x16   : > { %s1668_s10 = smov (!%p1053_p9, %s169_s10), %s1666_s9  ;;  %s176_s12 = sshra.s32 (!%p1055_p10), %s1319_s29, 3 }
  0x17   : > { %s1103_s13 = smul.u32 (!%p1055_p10), 48, %s1668_s10  ;;  %s1056_s14 = sshll.u32 (!%p1055_p10), %s176_s12, 2 }
  0x18   : > { %s179_s20 = scalar_lea.vmem (!%p1055_p10), %s1641_s0, %s1056_s14  ;;  %s183_s24 = scalar_lea.sflag (!%p1055_p10), [#allocation3], %s1668_s10 }
  0x19   : > { %v218_v0 = vld [vmem:[%s179_s20] sm:$0xff] (!%p1055_p10)  ;;  %v220_v1 = vld [vmem:[%s179_s20 + $0x8] sm:$0xff] (!%p1055_p10)  ;;  %v222_v2 = vld [vmem:[%s179_s20 + $0x10] sm:$0xff] (!%p1055_p10)  ;;  %s182_s21 = scalar_lea.vmem (!%p1055_p10), [#allocation2], %s1103_s13 }
  0x1a   : > { %219 = vst [vmem:[%s182_s21] sm:$0xff] %v218_v0  ;;  %221 = vst [vmem:[%s182_s21 + $0x8] sm:$0xff] %v220_v1  ;;  %v224_v3 = vld [vmem:[%s179_s20 + $0x28] sm:$0xff]  ;;  %v226_v4 = vld [vmem:[%s179_s20 + $0x30] sm:$0xff] }
  0x1b   : > { %223 = vst [vmem:[%s182_s21 + $0x10] sm:$0xff] %v222_v2  ;;  %v228_v5 = vld [vmem:[%s179_s20 + $0x38] sm:$0xff]  ;;  %225 = vst [vmem:[%s182_s21 + $0x18] sm:$0xff] %v224_v3 }
  0x1c   : > { %227 = vst [vmem:[%s182_s21 + $0x20] sm:$0xff] %v226_v4  ;;  %229 = vst [vmem:[%s182_s21 + $0x28] sm:$0xff] %v228_v5 }
  0x1d   : > { %237 = vsyncadd %s183_s24, 768 }
  0x1e PF: > { %s238_s25 = sadd.s32 1, %s1298_s18 }
  0x1f   : > { %p1058_p11 = scmp.ge.s32.totalorder %s238_s25, 3 }
  0x20   : > { %s243_s26 = ssub.s32 (!%p1058_p11), 1, %s1668_s10  ;;  %s1105_s27 = sadd.s32 (!%p1058_p11), 16, %s1319_s29 }
  0x21   : > { %242 = sbr.rel (%p1058_p11) target bundleno = 41 (0x29), region = 70  ;;  %s245_s28 = sshra.s32 (!%p1058_p11), %s1105_s27, 3 }
  0x22   : > { %s1106_s30 = smul.u32 (!%p1058_p11), 48, %s243_s26  ;;  %s1060_s5 = sshll.u32 (!%p1058_p11), %s245_s28, 2 }
  0x23   : > { %s248_s9 = scalar_lea.vmem (!%p1058_p11), %s1641_s0, %s1060_s5  ;;  %s252_s13 = scalar_lea.sflag (!%p1058_p11), [#allocation3], %s243_s26 }
  0x24   : > { %v287_v6 = vld [vmem:[%s248_s9] sm:$0xff] (!%p1058_p11)  ;;  %v289_v7 = vld [vmem:[%s248_s9 + $0x8] sm:$0xff] (!%p1058_p11)  ;;  %v291_v8 = vld [vmem:[%s248_s9 + $0x10] sm:$0xff] (!%p1058_p11)  ;;  %s251_s12 = scalar_lea.vmem (!%p1058_p11), [#allocation2], %s1106_s30 }
  0x25   : > { %288 = vst [vmem:[%s251_s12] sm:$0xff] (!%p1058_p11), %v287_v6  ;;  %290 = vst [vmem:[%s251_s12 + $0x8] sm:$0xff] (!%p1058_p11), %v289_v7  ;;  %v293_v9 = vld [vmem:[%s248_s9 + $0x28] sm:$0xff] (!%p1058_p11)  ;;  %v295_v10 = vld [vmem:[%s248_s9 + $0x30] sm:$0xff] (!%p1058_p11) }
  0x26   : > { %292 = vst [vmem:[%s251_s12 + $0x10] sm:$0xff] (!%p1058_p11), %v291_v8  ;;  %v297_v11 = vld [vmem:[%s248_s9 + $0x38] sm:$0xff] (!%p1058_p11)  ;;  %294 = vst [vmem:[%s251_s12 + $0x18] sm:$0xff] (!%p1058_p11), %v293_v9 }
  0x27   : > { %296 = vst [vmem:[%s251_s12 + $0x20] sm:$0xff] (!%p1058_p11), %v295_v10  ;;  %298 = vst [vmem:[%s251_s12 + $0x28] sm:$0xff] (!%p1058_p11), %v297_v11 }
  0x28   : > { %306 = vsyncadd %s252_s13, 768 }
  0x29 PF: > { %s1107_s14 = smul.u32 48, %s1668_s10  ;;  %s310_s17 = scalar_lea.sflag [#allocation3], %s1668_s10 }
  0x2b   : > { %s1344_s15 = scalar_lea.vmem [#allocation2], %s1107_s14 }
  0x2c   : > { %1248 = dma.done.wait %s310_s17, 768 }
  0x2d   : > { %1249 = vsyncadd %s310_s17, 4294966528  ;;  %v1206_v12 = vld [vmem:[%s1642_s1 + $0x40] sm:$0xff]   ;;  %v1209_v15 = vld [vmem:[%s1642_s1 + $0x48] sm:$0xff]   ;;  %v404_v19 = vlaneseq  ;;  %s1065_s5 = sadd.s32 4294967280, %s1319_s29 }
  0x2e   : > { %v1207_v13 = vld [vmem:[%s1642_s1] sm:$0xff]   ;;  %1124 = vmatprep.subr.bf16.mxu0 %v1206_v12  ;;  %v1210_v16 = vld [vmem:[%s1642_s1 + $0x8] sm:$0xff]   ;;  %v1212_v18 = vld [vmem:[%s1642_s1 + $0x50] sm:$0xff]   ;;  %v412_v31 = vstv %s1065_s5 }
  0x2f   : > { %v1208_v14 = vld [vmem:[%s1642_s1 + $0x80] sm:$0xff]   ;;  %1125 = vmatpush3.bf16.msra.mxu0 %v1207_v13  ;;  %v1211_v17 = vld [vmem:[%s1642_s1 + $0x88] sm:$0xff]   ;;  %v1213_v20 = vld [vmem:[%s1642_s1 + $0x10] sm:$0xff]   ;;  %v1380_v24 = vshrl.u32 %v404_v19, 7 }
  0x30   : > { %1162 = vmatprep.subr.bf16.mxu1 %v1208_v14  ;;  %1126 = vmatprep.subr.bf16.mxu0 %v1209_v15  ;;  %v1214_v21 = vld [vmem:[%s1642_s1 + $0x90] sm:$0xff]   ;;  %v1215_v22 = vld [vmem:[%s1642_s1 + $0x58] sm:$0xff]   ;;  %v1218_v26 = vld [vmem:[%s1642_s1 + $0x60] sm:$0xff]  }
  0x31   : > { %1163 = vmatpush3.bf16.msra.mxu1 %v1208_v14  ;;  %v1216_v23 = vld [vmem:[%s1642_s1 + $0x18] sm:$0xff]   ;;  %v1220_v27 = vld [vmem:[%s1642_s1 + $0xa0] sm:$0xff]   ;;  %v407_v28 = vadd.s32 16, %v1380_v24  ;;  %v408_v30 = vadd.s32 24, %v1380_v24  ;;  %v1221_v32 = vld [vmem:[%s1642_s1 + $0x68] sm:$0xff]   ;;  %v1406_v35 = vadd.s32 8, %v1380_v24  ;;  %v1409_v36 = vadd.s32 %v412_v31, %v1380_v24 }
  0x32   : > { %1164 = vmatprep.subr.bf16.mxu1 %v1211_v17  ;;  %v1217_v25 = vld [vmem:[%s1642_s1 + $0x98] sm:$0xff]   ;;  %v1219_v29 = vld [vmem:[%s1642_s1 + $0x20] sm:$0xff]   ;;  %v1223_v33 = vld [vmem:[%s1642_s1 + $0xa8] sm:$0xff]   ;;  %v409_v39 = vadd.s32 32, %v1380_v24  ;;  %v410_v41 = vadd.s32 40, %v1380_v24 }
  0x33   : > { %1127 = vmatpush3.bf16.msra.mxu0 %v1210_v16  ;;  %v1403_v34 = vadd.s32 %v412_v31, %v407_v28  ;;  %v1222_v37 = vld [vmem:[%s1642_s1 + $0x28] sm:$0xff]   ;;  %v1414_v38 = vadd.s32 %v412_v31, %v408_v30  ;;  %v1224_v40 = vld [vmem:[%s1642_s1 + $0x70] sm:$0xff]   ;;  %v1429_v44 = vadd.s32 %v412_v31, %v1406_v35  ;;  %vm419_vm1 = vcmp.ge.s32.totalorder %v1409_v36, 0  ;;  %v1227_v45 = vld [vmem:[%s1642_s1 + $0x78] sm:$0xff]  }
  0x34   : > { %1128 = vmatprep.subr.bf16.mxu0 %v1212_v18  ;;  %v1225_v42 = vld [vmem:[%s1642_s1 + $0x30] sm:$0xff]   ;;  %vm425_vm2 = vcmp.lt.s32.totalorder %v1409_v36, 40  ;;  %v1437_v46 = vadd.s32 %v412_v31, %v409_v39  ;;  %v317_v47 = vld [vmem:[%s1344_s15 + $0x8] sm:$0xff]  ;;  %v1444_v49 = vld [vmem:[%s1643_s2] ss:$0 sm:$0xff]  ;;  %v1448_v50 = vadd.s32 %v412_v31, %v410_v41 }
  0x35   : > { %1165 = vmatpush3.bf16.msra.mxu1 %v1211_v17  ;;  %v1226_v43 = vld [vmem:[%s1642_s1 + $0xb0] sm:$0xff]   ;;  %vm421_vm0 = vcmp.ge.s32.totalorder %v1403_v34, 0  ;;  %vm422_vm3 = vcmp.ge.s32.totalorder %v1414_v38, 0  ;;  %vm427_vm4 = vcmp.lt.s32.totalorder %v1403_v34, 40  ;;  %vm428_vm5 = vcmp.lt.s32.totalorder %v1414_v38, 40  ;;  %v1229_v56 = vld [vmem:[%s1642_s1 + $0xb8] sm:$0xff]   ;;  %vm1504_vm8 = vmand %vm419_vm1, %vm425_vm2 }
  0x36   : > { %1166 = vmatprep.subr.bf16.mxu1 %v1214_v21  ;;  %v320_v48 = vld [vmem:[%s1344_s15 + $0x20] sm:$0xff]  ;;  %v324_v51 = vunpack.c.l.bf16 %v317_v47  ;;  %v325_v52 = vunpack.c.h.bf16 %v317_v47  ;;  %vm420_vm6 = vcmp.ge.s32.totalorder %v1429_v44, 0  ;;  %vm426_vm7 = vcmp.lt.s32.totalorder %v1429_v44, 40  ;;  %v318_v60 = vld [vmem:[%s1344_s15 + $0x10] sm:$0xff]  ;;  %v1228_v61 = vld [vmem:[%s1642_s1 + $0x38] sm:$0xff]  }
  0x37   : > { %1129 = vmatpush3.bf16.msra.mxu0 %v1213_v20  ;;  %v330_v53 = vunpack.c.l.bf16 %v320_v48  ;;  %v331_v54 = vunpack.c.h.bf16 %v320_v48  ;;  %v316_v55 = vld [vmem:[%s1344_s15] sm:$0xff]  ;;  %vm429_vm9 = vcmp.lt.s32.totalorder %v1437_v46, 40  ;;  %v326_v4 = vunpack.c.l.bf16 %v318_v60  ;;  %vm1487_vm10 = vmand %vm421_vm0, %vm427_vm4  ;;  %v319_v39 = vld [vmem:[%s1344_s15 + $0x18] sm:$0xff] }
  0x38   : > { %1130 = vmatprep.subr.bf16.mxu0 %v1215_v22  ;;  %v1457_v57 = vld [vmem:[%s1643_s2 + $0x1] ss:$0 sm:$0xff]  ;;  %v322_v58 = vunpack.c.l.bf16 %v316_v55  ;;  %v323_v59 = vunpack.c.h.bf16 %v316_v55  ;;  %v341_v62 = vmul.f32 %v1444_v49, %v324_v51  ;;  %v342_v63 = vmul.f32 %v1444_v49, %v325_v52  ;;  %vm1495_vm11 = vmand %vm422_vm3, %vm428_vm5 }
  0x39   : > { %1167 = vmatpush3.bf16.msra.mxu1 %v1214_v21  ;;  %v347_v0 = vmul.f32 %v1444_v49, %v330_v53  ;;  %v348_v1 = vmul.f32 %v1444_v49, %v331_v54  ;;  %v327_v5 = vunpack.c.h.bf16 %v318_v60  ;;  %v343_v12 = vmul.f32 %v1444_v49, %v326_v4  ;;  %vm1517_vm3 = vmand %vm420_vm6, %vm426_vm7 }
  0x3a   : > { %1168 = vmatprep.subr.bf16.mxu1 %v1217_v25  ;;  %v339_v2 = vmul.f32 %v1444_v49, %v322_v58  ;;  %v340_v3 = vmul.f32 %v1444_v49, %v323_v59  ;;  %v358_v6 = vadd.f32 %v1457_v57, %v341_v62  ;;  %v359_v7 = vadd.f32 %v1457_v57, %v342_v63  ;;  %vm1230_vm1 = vmpackc.low %vm1495_vm11, %vm1487_vm10 }
  0x3b   : > { %1131 = vmatpush3.bf16.msra.mxu0 %v1216_v23  ;;  %v364_v8 = vadd.f32 %v1457_v57, %v347_v0  ;;  %v365_v9 = vadd.f32 %v1457_v57, %v348_v1  ;;  %v344_v13 = vmul.f32 %v1444_v49, %v327_v5  ;;  %v360_v19 = vadd.f32 %v1457_v57, %v343_v12 }
  0x3c   : > { %1132 = vmatprep.subr.bf16.mxu0 %v1218_v26  ;;  %v356_v10 = vadd.f32 %v1457_v57, %v339_v2  ;;  %v357_v11 = vadd.f32 %v1457_v57, %v340_v3  ;;  %vm370_vm12 = vcmp.gt.f32.partialorder %v358_v6, 0.0  ;;  %vm371_vm13 = vcmp.gt.f32.partialorder %v359_v7, 0.0 }
  0x3d   : > { %1169 = vmatpush3.bf16.msra.mxu1 %v1217_v25  ;;  %vm376_vm14 = vcmp.gt.f32.partialorder %v364_v8, 0.0  ;;  %vm377_vm15 = vcmp.gt.f32.partialorder %v365_v9, 0.0  ;;  %v382_v15 = vmul.f32 0.2, %v358_v6  ;;  %v383_v16 = vmul.f32 0.2, %v359_v7 }
  0x3e   : > { %1170 = vmatprep.subr.bf16.mxu1 %v1220_v27  ;;  %v388_v17 = vmul.f32 0.2, %v364_v8  ;;  %v389_v20 = vmul.f32 0.2, %v365_v9  ;;  %vm368_vm0 = vcmp.gt.f32.partialorder %v356_v10, 0.0  ;;  %vm369_vm4 = vcmp.gt.f32.partialorder %v357_v11, 0.0 }
  0x3f   : > { %1133 = vmatpush3.bf16.msra.mxu0 %v1219_v29  ;;  %v380_v21 = vmul.f32 0.2, %v356_v10  ;;  %v394_v23 = vsel %vm370_vm12, %v358_v6, %v382_v15  ;;  %v395_v25 = vsel %vm371_vm13, %v359_v7, %v383_v16  ;;  %vm372_vm2 = vcmp.gt.f32.partialorder %v360_v19, 0.0 }
  0x40   : > { %1134 = vmatprep.subr.bf16.mxu0 %v1221_v32  ;;  %v1511_v26 = vsel %vm376_vm14, %v364_v8, %v388_v17  ;;  %v1522_v29 = vsel %vm377_vm15, %v365_v9, %v389_v20  ;;  %v451_v30 = vsel %vm1487_vm10, %v394_v23, 0.0  ;;  %v452_v31 = vsel %vm1495_vm11, %v395_v25, 0.0 }
  0x41   : > { %1171 = vmatpush3.bf16.msra.mxu1 %v1220_v27  ;;  %v381_v27 = vmul.f32 0.2, %v357_v11  ;;  %v457_v32 = vsel %vm1487_vm10, %v1511_v26, 0.0  ;;  %v458_v34 = vsel %vm1495_vm11, %v1522_v29, 0.0  ;;  %v462_v36 = vpack.c.bf16 %v452_v31, %v451_v30 }
  0x42   : > { %1172 = vmatprep.subr.bf16.mxu1 %v1223_v33  ;;  %v1231_v44 = vpack.c.bf16 %v395_v25, %v394_v23  ;;  %v384_v47 = vmul.f32 0.2, %v360_v19  ;;  %vm1655_vm5 = vcmp.ge.s32.totalorder %v1437_v46, 0  ;;  %vm1658_vm12 = vcmp.lt.s32.totalorder %v1448_v50, 40 }
  0x43   : > { %1135 = vmatpush3.bf16.msra.mxu0 %v1222_v37  ;;  %v392_v37 = vsel %vm368_vm0, %v356_v10, %v380_v21  ;;  %v393_v38 = vsel %vm369_vm4, %v357_v11, %v381_v27  ;;  %468 = vst [vmem:[%s1344_s15 + $0x8] sm:$0xff] %v462_v36  ;;  %vm1557_vm6 = vmand %vm1655_vm5, %vm429_vm9  ;;  %vm1659_vm13 = vcmp.ge.s32.totalorder %v1448_v50, 0  ;;  %v328_v55 = vunpack.c.l.bf16 %v319_v39 }
  0x44   : > { %1136 = vmatprep.subr.bf16.mxu0 %v1224_v40  ;;  %v465_v40 = vpack.c.bf16 %v458_v34, %v457_v32  ;;  %v449_v41 = vsel %vm1504_vm8, %v392_v37, 0.0  ;;  %1232 = vmatprep.mubr.msk.bf16.mxu0 %vm1230_vm1, %v1231_v44  ;;  %vm1566_vm14 = vmand %vm1659_vm13, %vm1658_vm12  ;;  %v396_v46 = vsel %vm372_vm2, %v360_v19, %v384_v47  ;;  %v329_v58 = vunpack.c.h.bf16 %v319_v39 }
  0x45   : > { %1173 = vmatpush3.bf16.msra.mxu1 %v1223_v33  ;;  %v321_v33 = vld [vmem:[%s1344_s15 + $0x28] sm:$0xff]  ;;  %v453_v60 = vsel %vm1557_vm6, %v396_v46, 0.0  ;;  %v345_v50 = vmul.f32 %v1444_v49, %v328_v55  ;;  %vm502_vm0 = vcmask 1041408   ;;  %vm491_vm5 = vcmask 1043456  }
  0x46   : > { %1174 = vmatprep.subr.bf16.mxu1 %v1226_v43  ;;  %v332_v51 = vunpack.c.l.bf16 %v321_v33  ;;  %471 = vst [vmem:[%s1344_s15 + $0x20] sm:$0xff] %v465_v40  ;;  %v333_v54 = vunpack.c.h.bf16 %v321_v33  ;;  %v346_v0 = vmul.f32 %v1444_v49, %v329_v58  ;;  %v1234_v30 = vpack.c.bf16 %v1522_v29, %v1511_v26 }
  0x47   : > { %1137 = vmatpush3.bf16.msra.mxu0 %v1225_v42  ;;  %v450_v42 = vsel %vm1517_vm3, %v393_v38, 0.0  ;;  %v362_v3 = vadd.f32 %v1457_v57, %v345_v50  ;;  %v835_v55 = vstv %s1319_s29  ;;  %vm870_vm11 = vcmask 1040384   ;;  %s1112_s29 = sshll.u32 (%p1309_p4), %s1298_s18, 3 }
  0x48   : > { %1138 = vmatprep.subr.bf16.mxu0 %v1227_v45  ;;  %v461_v45 = vpack.c.bf16 %v450_v42, %v449_v41  ;;  %v363_v5 = vadd.f32 %v1457_v57, %v346_v0  ;;  %v836_v46 = vadd.s32 %v835_v55, %v1380_v24  ;;  %s886_s25 = scalar_lea.vmem (%p1309_p4), %s1644_s3, %s1112_s29 }
  0x49   : > { %1175 = vmatpush3.bf16.msra.mxu1 %v1226_v43  ;;  %v361_v43 = vadd.f32 %v1457_v57, %v344_v13  ;;  %vm374_vm4 = vcmp.gt.f32.partialorder %v362_v3, 0.0  ;;  %v386_v15 = vmul.f32 0.2, %v362_v3 }
  0x4a   : > { %1176 = vmatprep.subr.bf16.mxu1 %v1229_v56  ;;  %467 = vst [vmem:[%s1344_s15] sm:$0xff] %v461_v45  ;;  %v474_v6 = vld [vmem:[%s1344_s15 + $0x8] sm:$0x3f]  ;;  %vm375_vm2 = vcmp.gt.f32.partialorder %v363_v5, 0.0  ;;  %v387_v16 = vmul.f32 0.2, %v363_v5 }
  0x4b   : > { %1139 = vmatpush3.bf16.msra.mxu0 %v1228_v61  ;;  %vm373_vm7 = vcmp.gt.f32.partialorder %v361_v43, 0.0  ;;  %v385_v52 = vmul.f32 0.2, %v361_v43  ;;  %v350_v61 = vmul.f32 %v1444_v49, %v333_v54  ;;  %v504_v7 = vrot.slane %v474_v6, 6  ;;  %v479_v11 = vld [vmem:[%s1344_s15 + $0x8] sm:$0xfc] }
  0x4c   : > { %v492_v19 = vrot.slane %v479_v11, 4  ;;  %v398_v21 = vsel %vm374_vm4, %v362_v3, %v386_v15  ;;  %v399_v23 = vsel %vm375_vm2, %v363_v5, %v387_v16 }
  0x4d   : > { %1177 = vmatpush3.bf16.msra.mxu1 %v1229_v56  ;;  %v349_v56 = vmul.f32 %v1444_v49, %v332_v51  ;;  %v397_v59 = vsel %vm373_vm7, %v361_v43, %v385_v52  ;;  %v367_v2 = vadd.f32 %v1457_v57, %v350_v61  ;;  %v455_v25 = vsel %vm1504_vm8, %v398_v21, 0.0  ;;  %v481_v34 = vld [vmem:[%s1344_s15 + $0x20] sm:$0xfc] }
  0x4e   : > { %v454_v62 = vsel %vm1566_vm14, %v397_v59, 0.0  ;;  %v456_v31 = vsel %vm1517_vm3, %v399_v23, 0.0  ;;  %v508_v33 = vrot.slane %v492_v19, 6  ;;  %v495_v38 = vrot.slane %v481_v34, 4  ;;  %v476_v18 = vld [vmem:[%s1344_s15 + $0x20] sm:$0x3f] }
  0x4f   : > { %v366_v63 = vadd.f32 %v1457_v57, %v349_v56  ;;  %v463_v1 = vpack.c.bf16 %v454_v62, %v453_v60  ;;  %vm379_vm15 = vcmp.gt.f32.partialorder %v367_v2, 0.0  ;;  %v391_v8 = vmul.f32 0.2, %v367_v2 }
  0x50   : > { %v464_v22 = vpack.c.bf16 %v456_v31, %v455_v25  ;;  %v516_v39 = vrot.slane %v495_v38, 6  ;;  %v512_v28 = vrot.slane %v476_v18, 6  ;;  %v837_v56 = vadd.s32 %v835_v55, %v1406_v35 }
  0x51   : > { %vm378_vm9 = vcmp.gt.f32.partialorder %v366_v63, 0.0  ;;  %v390_v4 = vmul.f32 0.2, %v366_v63  ;;  %469 = vst [vmem:[%s1344_s15 + $0x10] sm:$0xff] %v463_v1  ;;  %v473_v10 = vld [vmem:[%s1344_s15] sm:$0xc0]  ;;  %v403_v13 = vsel %vm379_vm15, %v367_v2, %v391_v8 }
  0x52   : > { %v503_v12 = vrot.slane %v473_v10, 6  ;;  %v460_v57 = vsel %vm1566_vm14, %v403_v13, 0.0  ;;  %470 = vst [vmem:[%s1344_s15 + $0x18] sm:$0xff] %v464_v22  ;;  %vm838_vm8 = vcmp.lt.s32.totalorder %v836_v46, 40  ;;  %vm839_vm10 = vcmp.lt.s32.totalorder %v837_v56, 40 }
  0x53   : > { %v402_v9 = vsel %vm378_vm9, %v366_v63, %v390_v4 }
  0x54   : > { %v459_v49 = vsel %vm1557_vm6, %v402_v9, 0.0  ;;  %v505_v17 = vsel %vm502_vm0, %v503_v12, %v504_v7 }
  0x55   : > { %v466_v20 = vpack.c.bf16 %v460_v57, %v459_v49  ;;  %750 = vmatmul.mubr.bf16.vlgmr.msra.gmra.mrb[0].mxu0 %v505_v17 }
  0x56   : > { %1235 = vmatprep.mubr.msk.bf16.mxu0 %vm1230_vm1, %v1234_v30 }
  0x57   : > { %472 = vst [vmem:[%s1344_s15 + $0x28] sm:$0xff] %v466_v20 }
  0x58   : > { %v480_v27 = vld [vmem:[%s1344_s15 + $0x10] sm:$0x3] }
  0x59   : > { %v493_v32 = vrot.slane %v480_v27, 4  ;;  %v475_v41 = vld [vmem:[%s1344_s15 + $0x18] sm:$0xc0] }
  0x5a   : > { %v511_v43 = vrot.slane %v475_v41, 6 }
  0x5b   : > { %v494_v36 = vsel %vm491_vm5, %v492_v19, %v493_v32 }
  0x5c   : > { %v509_v37 = vrot.slane %v494_v36, 6  ;;  %v513_v45 = vsel %vm502_vm0, %v511_v43, %v512_v28 }
  0x5d   : > { %758 = vmatmul.mubr.bf16.gmra.mrb[4].mxu0 %v513_v45 }
  0x5e   : > { %v510_v26 = vsel %vm502_vm0, %v508_v33, %v509_v37  ;;  %v482_v14 = vld [vmem:[%s1344_s15 + $0x28] sm:$0x3] }
  0x5f   : > { %1178 = vmatprep.mubr.bf16.mxu1 %v510_v26  ;;  %v496_v29 = vrot.slane %v482_v14, 4 }
  0x61   : > { %v497_v40 = vsel %vm491_vm5, %v495_v38, %v496_v29 }
  0x62   : > { %v517_v42 = vrot.slane %v497_v40, 6 }
  0x64   : > { %v518_v44 = vsel %vm502_vm0, %v516_v39, %v517_v42 }
  0x65   : > { %1179 = vmatmul.mubr.bf16.vlgmr.msra.gmra.mrb[0].mxu1 %v518_v44 }
 0x128   : > { %v1140_v47 = vpop.f32.mrb[0].mxu0 }
 0x129   : > { %v1141_v48 = vpop.f32.mrb[1].mxu0 }
 0x12a   : > { %v1142_v51 = vadd.f32 %v1141_v48, %v1140_v47  ;;  %v1143_v52 = vpop.f32.mrb[2].mxu0 }
 0x12b   : > { %v1144_v53 = vpop.f32.mrb[3].mxu0 }
 0x12c   : > { %v1145_v54 = vadd.f32 %v1144_v53, %v1143_v52 }
 0x130   : > { %v1146_v59 = vpop.f32.mrb[4].mxu0 }
 0x131   : > { %v1147_v61 = vpop.f32.mrb[5].mxu0 }
 0x132   : > { %v1148_v63 = vadd.f32 %v1147_v61, %v1146_v59  ;;  %v1149_v0 = vpop.f32.mrb[6].mxu0 }
 0x133   : > { %v1150_v2 = vpop.f32.mrb[7].mxu0 }
 0x134   : > { %v1151_v24 = vadd.f32 %v1150_v2, %v1149_v0 }
 0x138   : > { %v1180_v58 = vpop.f32.mrb[0].mxu1 }
 0x139   : > { %v800_v60 = vpop.f32.mrb[1].mxu1  ;;  %v809_v5 = vadd.f32 %v1180_v58, %v1148_v63 }
 0x13a   : > { %v801_v50 = vadd.f32 %v1142_v51, %v800_v60  ;;  %v1181_v62 = vpop.f32.mrb[2].mxu1 }
 0x13b   : > { %v803_v1 = vpop.f32.mrb[3].mxu1  ;;  %v846_v7 = vsel %vm838_vm8, %v809_v5, 0.0  ;;  %v812_v8 = vadd.f32 %v1181_v62, %v1151_v24 }
 0x13c   : > { %v844_v3 = vsel %vm838_vm8, %v801_v50, 0.0  ;;  %v804_v4 = vadd.f32 %v1145_v54, %v803_v1  ;;  %v859_v49 = vmul.f32 %v846_v7, %v846_v7 }
 0x13d   : > { %v857_v9 = vmul.f32 %v844_v3, %v844_v3  ;;  %v1121_v12 = vpack.c.bf16 %v812_v8, %v809_v5  ;;  %v847_v13 = vsel %vm839_vm10, %v812_v8, 0.0 }
 0x13e   : > { %v1116_v6 = vpack.c.bf16 %v804_v4, %v801_v50  ;;  %v845_v35 = vsel %vm839_vm10, %v804_v4, 0.0  ;;  %v860_v16 = vmul.f32 %v847_v13, %v847_v13 }
 0x13f   : > { %v848_v10 = vadd.f32 %v845_v35, %v844_v3  ;;  %v858_v11 = vmul.f32 %v845_v35, %v845_v35  ;;  %1123 = vst [vmem:[%s1328_s11 + $0x8] sm:$0xff] %v1121_v12  }
 0x140   : > { %1117 = vst [vmem:[%s1328_s11] sm:$0xff] %v1116_v6  }
 0x141   : > { %v861_v15 = vadd.f32 %v858_v11, %v857_v9  ;;  %v849_v57 = vadd.f32 %v848_v10, %v846_v7 }
 0x143   : > { %v862_v17 = vadd.f32 %v861_v15, %v859_v49  ;;  %v850_v19 = vadd.f32 %v849_v57, %v847_v13 }
 0x145   : > { %v851_v20 = vrot.slane %v850_v19, 4  ;;  %v863_v21 = vadd.f32 %v862_v17, %v860_v16 }
 0x146   : > { %v906_v18 = vld [vmem:[%s1328_s11 + $0x8] sm:$0xff] (%p1309_p4)  }
 0x147   : > { %v852_v23 = vadd.f32 %v851_v20, %v850_v19  ;;  %v864_v25 = vrot.slane %v863_v21, 4  ;;  %v902_v26 = vld [vmem:[%s1328_s11] sm:$0xff] (%p1309_p4)   ;;  %907 = vst [vmem:[%s886_s25 + $0x18] sm:$0xff] (%p1309_p4), %v906_v18  }
 0x148   : > { %903 = vst [vmem:[%s886_s25] sm:$0xff] (%p1309_p4), %v902_v26  }
 0x149   : > { %v853_v27 = vrot.slane %v852_v23, 2  ;;  %v865_v30 = vadd.f32 %v864_v25, %v863_v21 }
 0x14b   : > { %v854_v31 = vadd.f32 %v853_v27, %v852_v23  ;;  %v866_v32 = vrot.slane %v865_v30, 2 }
 0x14d   : > { %v855_v22 = vrot.slane %v854_v31, 1  ;;  %v867_v33 = vadd.f32 %v866_v32, %v865_v30 }
 0x14e   : > { %883 = sbr.rel (!%p1309_p4) target bundleno = 341 (0x155), region = 108 }
 0x14f   : > { %v868_v34 = vrot.slane %v867_v33, 1  ;;  %v856_v36 = vadd.f32 %v855_v22, %v854_v31 }
 0x151   : > { %v869_v37 = vadd.f32 %v868_v34, %v867_v33 }
 0x153   : > { %v871_v38 = vsel %vm870_vm11, %v856_v36, %v869_v37 }
 0x154   : > { %872 = vst [vmem:[%s1324_s8] sm:$0x3] %v871_v38 }
 0x155 PF: > { %p12_p12 = scmp.ge.s32.totalorder %s1300_s19, 5   ;;  %s1662_s15 = smov %s1256_s16 }
 0x156   : > { %s1663_s16 = smov %s1307_s22  ;;  %s1664_s17 = smov %s1300_s19 }
 0x157   :  { %14 = sbr.rel (!%p12_p12) target bundleno = 2 (0x2), region = 209 }
 0x15e   :  { %960 = vsyncmov [#allocation3] }
 0x161   :  { %s961_s18 = vpop.sfrf %960 }
 0x162   :  { %p1101_p13 = scmp.ne.s32.totalorder %s961_s18, 0 }
 0x164   :  { %965 = shalt.err (%p1101_p13)  }
 0x165   :  { %967 = vsyncmov [#allocation3 + $0x1] }
 0x168   :  { %s968_s23 = vpop.sfrf %967 }
 0x169   :  { %p1102_p0 = scmp.ne.s32.totalorder %s968_s23, 0 }
 0x16b   :  { %972 = shalt.err (%p1102_p0)  }

// kernel: dilated_res_block.3
= control target key start
LH: loop header
LB: loop body
LE: loop exit
PB: predicated region body
PF: predicated region fallthrough
CT: control target
= control target key end

     0   :  { %s1877_s21 = smov 0   ;;  %s1879_s22 = smov 0   ;;  %s2200_s0 = inlined_call_operand.vmem [shape: bf16[2,80,128], index: 0, kind: input, shape index: {}]   ;;  %s2201_s1 = inlined_call_operand.vmem [shape: bf16[384,128], index: 1, kind: input, shape index: {}]   ;;  %s2202_s2 = inlined_call_operand.vmem [shape: bf16[384,128], index: 2, kind: input, shape index: {}]   ;;  %s2203_s3 = inlined_call_operand.vmem [shape: f32[1,128], index: 3, kind: input, shape index: {}]   ;;  %s2204_s4 = inlined_call_operand.vmem [shape: bf16[2,80,128], index: 4, kind: output, shape index: {0}]   ;;  %s2205_s5 = inlined_call_operand.vmem [shape: bf16[2,48,128], index: 5, kind: output, shape index: {1}]   ;;  %s2206_s6 = inlined_call_operand.vmem [shape: f32[3,2,128], index: 6, kind: output, shape index: {2}]  }
   0x1   :  { %s1881_s23 = smov 0   ;;  %s1883_s24 = smov 0  }
   0x2   :  { %s1885_s25 = smov 0  }
   0x3 LB: > { %s1896_s26 = sadd.s32 4294967295, %s1840_s25   ;;  %s1898_s27 = sadd.s32 1, %s1840_s25   ;;  %s1840_s25 = sphi %s1885_s25, %s2213_s25   ;;  %s1836_s24 = sphi %s1883_s24, %s2212_s24   ;;  %s1832_s23 = sphi %s1881_s23, %s2211_s23   ;;  %s1828_s22 = sphi %s1879_s22, %s2210_s22   ;;  %s1824_s21 = sphi %s1877_s21, %s2209_s21  }
   0x4   : > { %s85_s28 = sadd.s32 1, %s1898_s27  ;;  %s89_s29 = sadd.s32 1, %s1836_s24 }
   0x5   : > { %s86_s30 = ssub.s32 %s1898_s27, %s85_s28  ;;  %p99_p0 = scmp.ne.s32.totalorder %s1836_s24, %s1832_s23 }
   0x6   : > { %p87_p1 = scmp.eq.s32.totalorder %s86_s30, 0  ;;  %p100_p2 = scmp.eq.s32.totalorder %s1896_s26, 2 }
   0x7   : > { %s112_s7 = ssub.s32 %s1840_s25, %s1898_s27  ;;  %s115_s8 = sadd.s32 1, %s1828_s22 }
   0x8   : > { %s1908_s9 = scalar_select %p87_p1, %s1836_s24, %s89_s29  }
   0x9   : > { %p1910_p3 = por %p100_p2, %p99_p0  ;;  %p113_p4 = scmp.eq.s32.totalorder %s112_s7, 0 }
   0xa   : > { %p125_p5 = scmp.ne.s32.totalorder %s1828_s22, %s1824_s21  ;;  %p1472_p6 = scmp.ge.s32.totalorder %s1840_s25, 1 }
   0xb   : > { %s1916_s11 = scalar_select %p113_p4, %s1828_s22, %s115_s8  }
   0xc   : > { %p1918_p7 = por %p125_p5, %p100_p2  ;;  %p185_p8 = scmp.lt.s32.totalorder %s1840_s25, 4 }
   0xe   : > { %p186_p9 = pnand %p1472_p6, %p185_p8 }
   0xf   : > { %s200_s13 = sand.u32 (!%p186_p9), 1, %s1832_s23   ;;  %s206_s14 = sand.u32 (!%p186_p9), 1, %s1824_s21  }
  0x10   : > { %189 = sbr.rel (%p186_p9) target bundleno = 355 (0x163), region = 32  ;;  %s1473_s15 = sshll.u32 (!%p186_p9), %s200_s13, 4 }
  0x11   : > { %s1474_s16 = sshll.u32 (!%p186_p9), %s206_s14, 4  ;;  %p218_p10 = scmp.lt.s32.totalorder (!%p186_p9), %s1896_s26, 2 }
  0x12   : > { %p223_p11 = scmp.lt.s32.totalorder (!%p186_p9), %s1896_s26, 0  ;;  %s224_s17 = ssub.s32 (!%p186_p9), 0, %s1896_s26 }
  0x13   : > { %s1926_s18 = sshll.u32 (!%p186_p9), %s1896_s26, 4  ;;  %s1476_s20 = smin.u32 (!%p186_p9), %s1896_s26, %s224_s17 }
  0x14   : > { %s226_s28 = sand.u32 (!%p186_p9), 1, %s1476_s20   ;;  %s1937_s8 = scalar_lea.vmem (!%p186_p9), [#allocation4], %s1473_s15 }
  0x15   : > { %s227_s7 = ssub.s32 (!%p186_p9), 0, %s226_s28  ;;  %s1939_s13 = scalar_lea.vmem (!%p186_p9), [#allocation5], %s1474_s16 }
  0x16   : > { %p1480_p13 = scmp.ne.s32.totalorder (!%p186_p9), %s1896_s26, 0 }
  0x17   : > { %s219_s19 = scalar_select %p218_p10, %s1896_s26, 2 }
  0x18   : > { %s2215_s7 = smov (!%p223_p11, %s227_s7), %s226_s28  ;;  %239 = sbr.rel (%p1480_p13) target bundleno = 35 (0x23), region = 36 }
  0x19   : > { %s1475_s25 = sshll.u32 %s219_s19, 1  ;;  %p1478_p12 = scmp.lt.s32.totalorder %s2215_s7, 0 }
  0x1a   : > { %s1933_s30 = scalar_lea.vmem %s2206_s6, %s1475_s25  ;;  %s233_s21 = sadd.s32 2, %s2215_s7 }
  0x1b   : > { %s2217_s21 = smov (!%p1478_p12, %s233_s21), %s2215_s7  ;;  %s240_s14 = sshra.s32 (!%p1480_p13), %s1926_s18, 3 }
  0x1c   : > { %s1560_s17 = smul.u32 (!%p1480_p13), 48, %s2217_s21  ;;  %s1481_s19 = sshll.u32 (!%p1480_p13), %s240_s14, 2 }
  0x1d   : > { %s243_s28 = scalar_lea.vmem (!%p1480_p13), %s2200_s0, %s1481_s19  ;;  %s247_s16 = scalar_lea.sflag (!%p1480_p13), [#allocation3], %s2217_s21 }
  0x1e   : > { %v282_v0 = vld [vmem:[%s243_s28] sm:$0xff] (!%p1480_p13)  ;;  %v284_v1 = vld [vmem:[%s243_s28 + $0x8] sm:$0xff] (!%p1480_p13)  ;;  %v286_v2 = vld [vmem:[%s243_s28 + $0x10] sm:$0xff] (!%p1480_p13)  ;;  %s246_s15 = scalar_lea.vmem (!%p1480_p13), [#allocation2], %s1560_s17 }
  0x1f   : > { %283 = vst [vmem:[%s246_s15] sm:$0xff] %v282_v0  ;;  %285 = vst [vmem:[%s246_s15 + $0x8] sm:$0xff] %v284_v1  ;;  %v288_v3 = vld [vmem:[%s243_s28 + $0x28] sm:$0xff]  ;;  %v290_v4 = vld [vmem:[%s243_s28 + $0x30] sm:$0xff] }
  0x20   : > { %287 = vst [vmem:[%s246_s15 + $0x10] sm:$0xff] %v286_v2  ;;  %v292_v5 = vld [vmem:[%s243_s28 + $0x38] sm:$0xff]  ;;  %289 = vst [vmem:[%s246_s15 + $0x18] sm:$0xff] %v288_v3 }
  0x21   : > { %291 = vst [vmem:[%s246_s15 + $0x20] sm:$0xff] %v290_v4  ;;  %293 = vst [vmem:[%s246_s15 + $0x28] sm:$0xff] %v292_v5 }
  0x22   : > { %301 = vsyncadd %s247_s16, 768 }
  0x23 PF: > { %s302_s29 = sadd.s32 1, %s1896_s26 }
  0x24   : > { %p1483_p0 = scmp.ge.s32.totalorder %s302_s29, 3 }
  0x25   : > { %s307_s23 = ssub.s32 (!%p1483_p0), 1, %s2217_s21  ;;  %s1562_s7 = sadd.s32 (!%p1483_p0), 16, %s1926_s18 }
  0x26   : > { %306 = sbr.rel (%p1483_p0) target bundleno = 46 (0x2e), region = 74  ;;  %s309_s14 = sshra.s32 (!%p1483_p0), %s1562_s7, 3 }
  0x27   : > { %s1563_s17 = smul.u32 (!%p1483_p0), 48, %s307_s23  ;;  %s1485_s19 = sshll.u32 (!%p1483_p0), %s309_s14, 2 }
  0x28   : > { %s312_s28 = scalar_lea.vmem (!%p1483_p0), %s2200_s0, %s1485_s19  ;;  %s316_s16 = scalar_lea.sflag (!%p1483_p0), [#allocation3], %s307_s23 }
  0x29   : > { %v351_v6 = vld [vmem:[%s312_s28] sm:$0xff] (!%p1483_p0)  ;;  %v353_v7 = vld [vmem:[%s312_s28 + $0x8] sm:$0xff] (!%p1483_p0)  ;;  %v355_v8 = vld [vmem:[%s312_s28 + $0x10] sm:$0xff] (!%p1483_p0)  ;;  %s315_s15 = scalar_lea.vmem (!%p1483_p0), [#allocation2], %s1563_s17 }
  0x2a   : > { %352 = vst [vmem:[%s315_s15] sm:$0xff] (!%p1483_p0), %v351_v6  ;;  %354 = vst [vmem:[%s315_s15 + $0x8] sm:$0xff] (!%p1483_p0), %v353_v7  ;;  %v357_v9 = vld [vmem:[%s312_s28 + $0x28] sm:$0xff] (!%p1483_p0)  ;;  %v359_v10 = vld [vmem:[%s312_s28 + $0x30] sm:$0xff] (!%p1483_p0) }
  0x2b   : > { %356 = vst [vmem:[%s315_s15 + $0x10] sm:$0xff] (!%p1483_p0), %v355_v8  ;;  %v361_v11 = vld [vmem:[%s312_s28 + $0x38] sm:$0xff] (!%p1483_p0)  ;;  %358 = vst [vmem:[%s315_s15 + $0x18] sm:$0xff] (!%p1483_p0), %v357_v9 }
  0x2c   : > { %360 = vst [vmem:[%s315_s15 + $0x20] sm:$0xff] (!%p1483_p0), %v359_v10  ;;  %362 = vst [vmem:[%s315_s15 + $0x28] sm:$0xff] (!%p1483_p0), %v361_v11 }
  0x2d   : > { %370 = vsyncadd %s316_s16, 768 }
  0x2e PF: > { %s1564_s29 = smul.u32 48, %s2217_s21  ;;  %s374_s14 = scalar_lea.sflag [#allocation3], %s2217_s21 }
  0x30   : > { %s1955_s7 = scalar_lea.vmem [#allocation2], %s1564_s29 }
  0x31   : > { %1820 = dma.done.wait %s374_s14, 768 }
  0x32   : > { %1821 = vsyncadd %s374_s14, 4294966528  ;;  %v1752_v12 = vld [vmem:[%s2201_s1 + $0x40] sm:$0xff]   ;;  %v1755_v15 = vld [vmem:[%s2201_s1 + $0x48] sm:$0xff]   ;;  %vm398_vm0 = vcmask 1045504   ;;  %vm409_vm1 = vcmask 1040384   ;;  %vm768_vm3 = vcmask 1046528  }
  0x33   : > { %v1753_v13 = vld [vmem:[%s2201_s1] sm:$0xff]   ;;  %1596 = vmatprep.subr.bf16.mxu0 %v1752_v12  ;;  %v1756_v16 = vld [vmem:[%s2201_s1 + $0x8] sm:$0xff]   ;;  %v1758_v18 = vld [vmem:[%s2201_s1 + $0x50] sm:$0xff]   ;;  %vm775_vm2 = vsmask.f32 256 }
  0x34   : > { %v1754_v14 = vld [vmem:[%s2201_s1 + $0x80] sm:$0xff]   ;;  %1597 = vmatpush3.bf16.msra.mxu0 %v1753_v13  ;;  %v1757_v17 = vld [vmem:[%s2201_s1 + $0x88] sm:$0xff]   ;;  %v1759_v19 = vld [vmem:[%s2201_s1 + $0x10] sm:$0xff]  }
  0x35   : > { %1672 = vmatprep.subr.bf16.mxu1 %v1754_v14  ;;  %1598 = vmatprep.subr.bf16.mxu0 %v1755_v15  ;;  %v1760_v20 = vld [vmem:[%s2201_s1 + $0x90] sm:$0xff]   ;;  %v1761_v21 = vld [vmem:[%s2201_s1 + $0x58] sm:$0xff]   ;;  %v1764_v24 = vld [vmem:[%s2201_s1 + $0x60] sm:$0xff]  }
  0x36   : > { %1673 = vmatpush3.bf16.msra.mxu1 %v1754_v14  ;;  %v1762_v22 = vld [vmem:[%s2201_s1 + $0x18] sm:$0xff]   ;;  %v1766_v25 = vld [vmem:[%s2201_s1 + $0xa0] sm:$0xff]   ;;  %v1767_v27 = vld [vmem:[%s2201_s1 + $0x68] sm:$0xff]  }
  0x37   : > { %1674 = vmatprep.subr.bf16.mxu1 %v1757_v17  ;;  %v1763_v23 = vld [vmem:[%s2201_s1 + $0x98] sm:$0xff]   ;;  %v1765_v26 = vld [vmem:[%s2201_s1 + $0x20] sm:$0xff]   ;;  %v1769_v28 = vld [vmem:[%s2201_s1 + $0xa8] sm:$0xff]  }
  0x38   : > { %1599 = vmatpush3.bf16.msra.mxu0 %v1756_v16  ;;  %v1768_v29 = vld [vmem:[%s2201_s1 + $0x28] sm:$0xff]   ;;  %v1770_v30 = vld [vmem:[%s2201_s1 + $0x70] sm:$0xff]   ;;  %v1773_v33 = vld [vmem:[%s2201_s1 + $0x78] sm:$0xff]  }
  0x39   : > { %1600 = vmatprep.subr.bf16.mxu0 %v1758_v18  ;;  %v1771_v31 = vld [vmem:[%s2201_s1 + $0x30] sm:$0xff]   ;;  %v2025_v34 = vld [vmem:[%s1955_s7 + $0x8] sm:$0xff]  ;;  %v1776_v46 = vld [vmem:[%s2202_s2 + $0x40] sm:$0xff]  }
  0x3a   : > { %1675 = vmatpush3.bf16.msra.mxu1 %v1757_v17  ;;  %v1772_v32 = vld [vmem:[%s2201_s1 + $0xb0] sm:$0xff]   ;;  %v381_v36 = vld [vmem:[%s1955_s7 + $0x8] sm:$0x7f]  ;;  %656 = vmatprep.mubr.bf16.mxu0 %v2025_v34  ;;  %v751_v43 = vshll.u32 %v2025_v34, 16  ;;  %v1777_v51 = vld [vmem:[%s2202_s2] sm:$0xff]   ;;  %v754_v2 = vshrl.u32 %v2025_v34, 16 }
  0x3b   : > { %1676 = vmatprep.subr.bf16.mxu1 %v1760_v20  ;;  %v380_v35 = vld [vmem:[%s1955_s7] sm:$0x80]  ;;  %v1774_v37 = vld [vmem:[%s2201_s1 + $0x38] sm:$0xff]   ;;  %v411_v40 = vrot.slane %v381_v36, 7  ;;  %v387_v42 = vld [vmem:[%s1955_s7 + $0x10] sm:$0x1] }
  0x3c   : > { %1601 = vmatpush3.bf16.msra.mxu0 %v1759_v19  ;;  %v1775_v38 = vld [vmem:[%s2201_s1 + $0xb8] sm:$0xff]   ;;  %v410_v39 = vrot.slane %v380_v35, 7  ;;  %v400_v45 = vrot.slane %v387_v42, 2  ;;  %v388_v47 = vld [vmem:[%s1955_s7 + $0x20] sm:$0xfe]  ;;  %v753_v59 = vrot.slane %v751_v43, 1 }
  0x3d   : > { %1602 = vmatprep.subr.bf16.mxu0 %v1761_v21  ;;  %v386_v41 = vld [vmem:[%s1955_s7 + $0x8] sm:$0xfe]  ;;  %v389_v48 = vld [vmem:[%s1955_s7 + $0x28] sm:$0x1]  ;;  %v402_v52 = vrot.slane %v388_v47, 2  ;;  %v1778_v55 = vld [vmem:[%s2202_s2 + $0x80] sm:$0xff]  }
  0x3e   : > { %1677 = vmatpush3.bf16.msra.mxu1 %v1760_v20  ;;  %v399_v44 = vrot.slane %v386_v41, 2  ;;  %v403_v53 = vrot.slane %v389_v48, 2  ;;  %v412_v56 = vsel %vm409_vm1, %v410_v39, %v411_v40  ;;  %v1779_v62 = vld [vmem:[%s2202_s2 + $0x48] sm:$0xff]   ;;  %v2063_v0 = vld [vmem:[%s1955_s7 + $0x20] sm:$0xff]  ;;  %v756_v9 = vor.u32 %v754_v2, %v753_v59  ;;  %v1785_v15 = vld [vmem:[%s2202_s2 + $0x58] sm:$0xff]  }
  0x3f   : > { %1678 = vmatprep.subr.bf16.mxu1 %v1763_v23  ;;  %v423_v58 = vrot.slane %v402_v52, 7  ;;  %v1780_v63 = vld [vmem:[%s2202_s2 + $0x8] sm:$0xff]   ;;  %v383_v5 = vld [vmem:[%s1955_s7 + $0x20] sm:$0x7f]  ;;  %v784_v10 = vshrl.u32 %v753_v59, 16  ;;  %v1787_v19 = vld [vmem:[%s2202_s2 + $0x98] sm:$0xff]  }
  0x40   : > { %1603 = vmatpush3.bf16.msra.mxu0 %v1762_v22  ;;  %v401_v49 = vsel %vm398_vm0, %v399_v44, %v400_v45  ;;  %v415_v50 = vrot.slane %v399_v44, 7  ;;  %v404_v57 = vsel %vm398_vm0, %v402_v52, %v403_v53  ;;  %v382_v1 = vld [vmem:[%s1955_s7 + $0x18] sm:$0x80]  ;;  %v419_v7 = vrot.slane %v383_v5, 7  ;;  %v1782_v8 = vld [vmem:[%s2202_s2 + $0x50] sm:$0xff]   ;;  %v1788_v22 = vld [vmem:[%s2202_s2 + $0x60] sm:$0xff]  }
  0x41   : > { %1604 = vmatprep.subr.bf16.mxu0 %v1764_v24  ;;  %v416_v54 = vrot.slane %v401_v49, 7  ;;  %v424_v61 = vrot.slane %v404_v57, 7  ;;  %v1781_v4 = vld [vmem:[%s2202_s2 + $0x88] sm:$0xff]   ;;  %v418_v6 = vrot.slane %v382_v1, 7  ;;  %v1784_v11 = vld [vmem:[%s2202_s2 + $0x90] sm:$0xff]   ;;  %v788_v12 = vshrl.u32 %v756_v9, 16 }
  0x42   : > { %1679 = vmatpush3.bf16.msra.mxu1 %v1763_v23  ;;  %v1783_v14 = vld [vmem:[%s2202_s2 + $0x10] sm:$0xff]   ;;  %v786_v17 = vrot.slane %v784_v10, 7  ;;  %v791_v18 = vshll.u32 %v756_v9, 16  ;;  %v1786_v20 = vld [vmem:[%s2202_s2 + $0x18] sm:$0xff]   ;;  %v1790_v24 = vld [vmem:[%s2202_s2 + $0xa0] sm:$0xff]   ;;  %v780_v42 = vrot.slane %v754_v2, 7 }
  0x43   : > { %1680 = vmatprep.subr.bf16.mxu1 %v1766_v25  ;;  %v417_v60 = vsel %vm409_vm1, %v415_v50, %v416_v54  ;;  %v425_v3 = vsel %vm409_vm1, %v423_v58, %v424_v61  ;;  %v420_v13 = vsel %vm409_vm1, %v418_v6, %v419_v7  ;;  %v790_v16 = vrot.slane %v788_v12, 7  ;;  %v742_v35 = vld [vmem:[%s1955_s7] sm:$0x80]  ;;  %v747_v36 = vld [vmem:[%s1955_s7 + $0x10] sm:$0x1] }
  0x44   : > { %1605 = vmatpush3.bf16.msra.mxu0 %v1765_v26  ;;  %1688 = vmatprep.mubr.bf16.mxu1 %v417_v60  ;;  %v1791_v26 = vld [vmem:[%s2202_s2 + $0x68] sm:$0xff]   ;;  %v1796_v41 = vld [vmem:[%s2202_s2 + $0xb0] sm:$0xff]   ;;  %v777_v47 = vshrl.u32 %v742_v35, 16  ;;  %v1799_v60 = vld [vmem:[%s2202_s2 + $0xb8] sm:$0xff]   ;;  %v781_v2 = vor.u32 %v780_v42, %v751_v43 }
  0x45   : > { %1606 = vmatprep.subr.bf16.mxu0 %v1767_v27  ;;  %v793_v21 = vor.u32 %v791_v18, %v790_v16  ;;  %v769_v27 = vrot.slane %v2025_v34, 1  ;;  %v749_v39 = vld [vmem:[%s1955_s7 + $0x28] sm:$0x1]  ;;  %v744_v7 = vld [vmem:[%s1955_s7 + $0x18] sm:$0x80] }
  0x46   : > { %1681 = vmatpush3.bf16.msra.mxu1 %v1766_v25  ;;  %v1789_v25 = vld [vmem:[%s2202_s2 + $0x20] sm:$0xff]   ;;  %v773_v45 = vrot.slane %v749_v39, 1  ;;  %v779_v1 = vrot.slane %v777_v47, 7  ;;  %v808_v12 = vshrl.u32 %v744_v7, 16 }
  0x47   : > { %1682 = vmatprep.subr.bf16.mxu1 %v1769_v28  ;;  %v794_v23 = vsel %vm775_vm2, %v786_v17, %v793_v21  ;;  %v796_v44 = vshrl.u32 %v769_v27, 16  ;;  %v1165_v17 = vlaneseq }
  0x48   : > { %1607 = vmatpush3.bf16.msra.mxu0 %v1768_v29  ;;  %v1793_v29 = vld [vmem:[%s2202_s2 + $0xa8] sm:$0xff]  }
  0x49   : > { %1608 = vmatprep.subr.bf16.mxu0 %v1770_v30  ;;  %v761_v30 = vshrl.u32 %v2063_v0, 16  ;;  %v798_v61 = vrot.slane %v796_v44, 7  ;;  %v1166_v18 = vshrl.u32 %v1165_v17, 7 }
  0x4a   : > { %1683 = vmatpush3.bf16.msra.mxu1 %v1769_v28  ;;  %v758_v28 = vshll.u32 %v2063_v0, 16 }
  0x4b   : > { %1684 = vmatprep.subr.bf16.mxu1 %v1772_v32  ;;  %v811_v34 = vrot.slane %v761_v30, 7 }
  0x4c   : > { %1609 = vmatpush3.bf16.msra.mxu0 %v1771_v31  ;;  %v1792_v31 = vld [vmem:[%s2202_s2 + $0x28] sm:$0xff]  }
  0x4d   : > { %1610 = vmatprep.subr.bf16.mxu0 %v1773_v33  ;;  %v1794_v33 = vld [vmem:[%s2202_s2 + $0x70] sm:$0xff]  }
  0x4e   : > { %1685 = vmatpush3.bf16.msra.mxu1 %v1772_v32  ;;  %v760_v32 = vrot.slane %v758_v28, 1 }
  0x4f   : > { %1686 = vmatprep.subr.bf16.mxu1 %v1775_v38 }
  0x50   : > { %1611 = vmatpush3.bf16.msra.mxu0 %v1774_v37  ;;  %v772_v37 = vrot.slane %v2063_v0, 1  ;;  %v763_v40 = vor.u32 %v761_v30, %v760_v32  ;;  %v815_v49 = vshrl.u32 %v760_v32, 16 }
  0x51   : > { %1634 = vmatprep.subr.bf16.mxu0 %v1776_v46  ;;  %v1795_v46 = vld [vmem:[%s2202_s2 + $0x30] sm:$0xff]  }
  0x52   : > { %1687 = vmatpush3.bf16.msra.mxu1 %v1775_v38  ;;  %v770_v38 = vrot.slane %v747_v36, 1  ;;  %v819_v50 = vshrl.u32 %v763_v40, 16  ;;  %v774_v54 = vsel %vm768_vm3, %v772_v37, %v773_v45  ;;  %v817_v5 = vrot.slane %v815_v49, 7 }
  0x53   : > { %657 = vmatmul.mubr.bf16.vlgmr.msra.gmra.mrb[0].mxu0 %v412_v56  ;;  %1692 = vmatprep.subr.bf16.mxu1 %v1778_v55  ;;  %v827_v56 = vshrl.u32 %v772_v37, 16  ;;  %v831_v57 = vshrl.u32 %v774_v54, 16  ;;  %v834_v58 = vshll.u32 %v774_v54, 16 }
  0x54   : > { %1635 = vmatpush3.bf16.msra.mxu0 %v1777_v51  ;;  %664 = vmatprep.mubr.bf16.mxu0 %v2063_v0  ;;  %v771_v48 = vsel %vm768_vm3, %v769_v27, %v770_v38  ;;  %v1797_v51 = vld [vmem:[%s2202_s2 + $0x78] sm:$0xff]   ;;  %v821_v59 = vrot.slane %v819_v50, 7 }
  0x55   : > { %1689 = vmatmul.mubr.bf16.vlgmr.msra.gmra.mrb[0].mxu1 %v425_v3  ;;  %1636 = vmatprep.subr.bf16.mxu0 %v1779_v62  ;;  %v800_v52 = vshrl.u32 %v771_v48, 16  ;;  %v803_v53 = vshll.u32 %v771_v48, 16  ;;  %v833_v3 = vrot.slane %v831_v57, 7 }
  0x56   : > { %1693 = vmatpush3.bf16.msra.mxu1 %v1778_v55  ;;  %v822_v55 = vshll.u32 %v763_v40, 16 }
  0x57   : > { %1694 = vmatprep.subr.bf16.mxu1 %v1781_v4  ;;  %v802_v62 = vrot.slane %v800_v52, 7  ;;  %v836_v9 = vor.u32 %v834_v58, %v833_v3 }
  0x58   : > { %1637 = vmatpush3.bf16.msra.mxu0 %v1780_v63  ;;  %v1798_v63 = vld [vmem:[%s2202_s2 + $0x38] sm:$0xff]   ;;  %v824_v6 = vor.u32 %v822_v55, %v821_v59 }
  0x59   : > { %1638 = vmatprep.subr.bf16.mxu0 %v1782_v8  ;;  %v829_v8 = vrot.slane %v827_v56, 7 }
  0x5a   : > { %1695 = vmatpush3.bf16.msra.mxu1 %v1781_v4  ;;  %v805_v4 = vor.u32 %v803_v53, %v802_v62  ;;  %v825_v43 = vsel %vm775_vm2, %v817_v5, %v824_v6 }
  0x5b   : > { %665 = vmatmul.mubr.bf16.gmra.mrb[4].mxu0 %v420_v13  ;;  %1696 = vmatprep.subr.bf16.mxu1 %v1784_v11  ;;  %v837_v13 = vsel %vm775_vm2, %v829_v8, %v836_v9 }
  0x5c   : > { %1639 = vmatpush3.bf16.msra.mxu0 %v1783_v14  ;;  %1068 = vmatprep.mubr.bf16.mxu0 %v794_v23  ;;  %v806_v10 = vsel %vm775_vm2, %v798_v61, %v805_v4  ;;  %v810_v14 = vrot.slane %v808_v12, 7 }
  0x5d   : > { %1640 = vmatprep.subr.bf16.mxu0 %v1785_v15  ;;  %1708 = vmatprep.mubr.bf16.mxu1 %v806_v10  ;;  %v812_v15 = vor.u32 %v811_v34, %v758_v28 }
  0x5e   : > { %1697 = vmatpush3.bf16.msra.mxu1 %v1784_v11  ;;  %v782_v11 = vsel %vm775_vm2, %v779_v1, %v781_v2 }
  0x5f   : > { %1698 = vmatprep.subr.bf16.mxu1 %v1787_v19  ;;  %v813_v16 = vsel %vm775_vm2, %v810_v14, %v812_v15 }
  0x60   : > { %1641 = vmatpush3.bf16.msra.mxu0 %v1786_v20  ;;  %v1167_v20 = vadd.s32 8, %v1166_v18 }
  0x61   : > { %1642 = vmatprep.subr.bf16.mxu0 %v1788_v22 }
  0x62   : > { %1699 = vmatpush3.bf16.msra.mxu1 %v1787_v19  ;;  %v1168_v19 = vstv %s1926_s18 }
  0x63   : > { %1700 = vmatprep.subr.bf16.mxu1 %v1790_v24  ;;  %v1169_v21 = vadd.s32 %v1168_v19, %v1166_v18  ;;  %v1542_v18 = vld [vmem:[%s2203_s3] ss:$0 sm:$0xff] }
  0x64   : > { %1643 = vmatpush3.bf16.msra.mxu0 %v1789_v25 }
  0x65   : > { %1644 = vmatprep.subr.bf16.mxu0 %v1791_v26  ;;  %vm1171_vm4 = vcmp.lt.s32.totalorder %v1169_v21, 40 }
  0x66   : > { %1701 = vmatpush3.bf16.msra.mxu1 %v1790_v24  ;;  %v1170_v24 = vadd.s32 %v1168_v19, %v1167_v20 }
  0x67   : > { %1702 = vmatprep.subr.bf16.mxu1 %v1793_v29 }
  0x68   : > { %1645 = vmatpush3.bf16.msra.mxu0 %v1792_v31  ;;  %vm1172_vm5 = vcmp.lt.s32.totalorder %v1170_v24, 40 }
  0x69   : > { %1646 = vmatprep.subr.bf16.mxu0 %v1794_v33 }
  0x6a   : > { %1703 = vmatpush3.bf16.msra.mxu1 %v1793_v29 }
  0x6b   : > { %1704 = vmatprep.subr.bf16.mxu1 %v1796_v41 }
  0x6c   : > { %1647 = vmatpush3.bf16.msra.mxu0 %v1795_v46 }
  0x6d   : > { %1648 = vmatprep.subr.bf16.mxu0 %v1797_v51 }
  0x6e   : > { %1705 = vmatpush3.bf16.msra.mxu1 %v1796_v41 }
  0x6f   : > { %1706 = vmatprep.subr.bf16.mxu1 %v1799_v60 }
  0x70   : > { %1649 = vmatpush3.bf16.msra.mxu0 %v1798_v63 }
  0x72   : > { %1707 = vmatpush3.bf16.msra.mxu1 %v1799_v60 }
  0x73   : > { %1069 = vmatmul.mubr.bf16.vlgmr.msra.gmra.mrb[8].mxu0 %v782_v11 }
  0x74   : > { %1076 = vmatprep.mubr.bf16.mxu0 %v825_v43 }
  0x75   : > { %1709 = vmatmul.mubr.bf16.vlgmr.msra.gmra.mrb[4].mxu1 %v837_v13 }
  0x7b   : > { %1077 = vmatmul.mubr.bf16.gmra.mrb[12].mxu0 %v813_v16 }
 0x126   : > { %v1612_v22 = vpop.f32.mrb[0].mxu0 }
 0x127   : > { %v1613_v23 = vpop.f32.mrb[1].mxu0 }
 0x128   : > { %v1614_v25 = vadd.f32 %v1613_v23, %v1612_v22  ;;  %v1615_v26 = vpop.f32.mrb[2].mxu0  ;;  %v1690_v27 = vpop.f32.mrb[0].mxu1 }
 0x129   : > { %v1616_v29 = vpop.f32.mrb[3].mxu0  ;;  %v707_v30 = vpop.f32.mrb[1].mxu1 }
 0x12a   : > { %v1617_v0 = vadd.f32 %v1616_v29, %v1615_v26  ;;  %v708_v28 = vadd.f32 %v1614_v25, %v707_v30  ;;  %v1691_v31 = vpop.f32.mrb[2].mxu1 }
 0x12b   : > { %v710_v32 = vpop.f32.mrb[3].mxu1 }
 0x12c   : > { %v1177_v33 = vsel %vm1171_vm4, %v708_v28, 0.0  ;;  %v711_v35 = vadd.f32 %v1617_v0, %v710_v32 }
 0x12d   : > { %v1190_v39 = vmul.f32 %v1177_v33, %v1177_v33 }
 0x12e   : > { %v1577_v36 = vpack.c.bf16 %v711_v35, %v708_v28  ;;  %v1178_v37 = vsel %vm1172_vm5, %v711_v35, 0.0  ;;  %v1618_v38 = vpop.f32.mrb[4].mxu0 }
 0x12f   : > { %v1181_v40 = vadd.f32 %v1178_v37, %v1177_v33  ;;  %v1191_v41 = vmul.f32 %v1178_v37, %v1178_v37  ;;  %v1619_v42 = vpop.f32.mrb[5].mxu0 }
 0x130   : > { %1578 = vst [vmem:[%s1937_s8] sm:$0xff] %v1577_v36   ;;  %v1620_v44 = vadd.f32 %v1619_v42, %v1618_v38  ;;  %v1621_v45 = vpop.f32.mrb[6].mxu0 }
 0x131   : > { %v1194_v46 = vadd.f32 %v1191_v41, %v1190_v39  ;;  %v1622_v47 = vpop.f32.mrb[7].mxu0 }
 0x132   : > { %v716_v48 = vadd.f32 %v1690_v27, %v1620_v44  ;;  %v1623_v49 = vadd.f32 %v1622_v47, %v1621_v45 }
 0x134   : > { %v1179_v50 = vsel %vm1171_vm4, %v716_v48, 0.0  ;;  %v719_v51 = vadd.f32 %v1691_v31, %v1623_v49 }
 0x135   : > { %v1182_v52 = vadd.f32 %v1181_v40, %v1179_v50  ;;  %v1192_v53 = vmul.f32 %v1179_v50, %v1179_v50 }
 0x136   : > { %v1582_v54 = vpack.c.bf16 %v719_v51, %v716_v48  ;;  %v1180_v55 = vsel %vm1172_vm5, %v719_v51, 0.0 }
 0x137   : > { %v1195_v56 = vadd.f32 %v1194_v46, %v1192_v53  ;;  %v1183_v57 = vadd.f32 %v1182_v52, %v1180_v55  ;;  %v1193_v58 = vmul.f32 %v1180_v55, %v1180_v55  ;;  %v1240_v35 = vld [vmem:[%s1937_s8] sm:$0xff] (%p1910_p3)  }
 0x138   : > { %1594 = vst [vmem:[%s1937_s8 + $0x8] sm:$0xff] %v1582_v54  }
 0x139   : > { %v1184_v59 = vrot.slane %v1183_v57, 4  ;;  %v1196_v60 = vadd.f32 %v1195_v56, %v1193_v58 }
 0x13b   : > { %v1185_v61 = vadd.f32 %v1184_v59, %v1183_v57  ;;  %v1197_v62 = vrot.slane %v1196_v60, 4 }
 0x13d   : > { %v1186_v63 = vrot.slane %v1185_v61, 2  ;;  %v1198_v1 = vadd.f32 %v1197_v62, %v1196_v60 }
 0x13f   : > { %v1187_v2 = vadd.f32 %v1186_v63, %v1185_v61  ;;  %v1199_v3 = vrot.slane %v1198_v1, 2  ;;  %v1244_v36 = vld [vmem:[%s1937_s8 + $0x8] sm:$0xff] (%p1910_p3)  }
 0x141   : > { %v1188_v4 = vrot.slane %v1187_v2, 1  ;;  %v1200_v5 = vadd.f32 %v1199_v3, %v1198_v1 }
 0x143   : > { %v1201_v6 = vrot.slane %v1200_v5, 1  ;;  %v1189_v7 = vadd.f32 %v1188_v4, %v1187_v2 }
 0x145   : > { %v1202_v8 = vadd.f32 %v1201_v6, %v1200_v5 }
 0x146   : > { %v1650_v9 = vpop.f32.mrb[8].mxu0 }
 0x147   : > { %v1204_v10 = vsel %vm409_vm1, %v1189_v7, %v1202_v8  ;;  %v1651_v11 = vpop.f32.mrb[9].mxu0 }
 0x148   : > { %1205 = vst [vmem:[%s1933_s30] sm:$0x3] %v1204_v10  ;;  %v1652_v12 = vadd.f32 %v1651_v11, %v1650_v9  ;;  %v1653_v34 = vpop.f32.mrb[10].mxu0  ;;  %v1710_v43 = vpop.f32.mrb[4].mxu1  ;;  %s1549_s30 = sshll.u32 (%p1910_p3), %s1896_s26, 3 }
 0x149   : > { %v1654_v13 = vpop.f32.mrb[11].mxu0  ;;  %v1119_v14 = vpop.f32.mrb[5].mxu1  ;;  %s1403_s14 = scalar_lea.vmem (%p1910_p3), %s2204_s4, %s1549_s30 }
 0x14a   : > { %v1655_v15 = vadd.f32 %v1654_v13, %v1653_v34  ;;  %v1120_v16 = vadd.f32 %v1652_v12, %v1119_v14  ;;  %v1711_v17 = vpop.f32.mrb[6].mxu1  ;;  %1550 = vst [vmem:[%s1403_s14 + $0x8] sm:$0xff] (%p1910_p3), %v1240_v35   ;;  %1552 = vst [vmem:[%s1403_s14 + $0x30] sm:$0xff] (%p1910_p3), %v1244_v36  }
 0x14b   : > { %v1122_v19 = vpop.f32.mrb[7].mxu1 }
 0x14c   : > { %v1123_v20 = vadd.f32 %v1655_v15, %v1122_v19  ;;  %v1141_v21 = vadd.f32 %v1542_v18, %v1120_v16 }
 0x14e   : > { %v1142_v22 = vadd.f32 %v1542_v18, %v1123_v20  ;;  %v1656_v23 = vpop.f32.mrb[12].mxu0 }
 0x14f   : > { %v1657_v24 = vpop.f32.mrb[13].mxu0 }
 0x150   : > { %v1587_v25 = vpack.c.bf16 %v1142_v22, %v1141_v21  ;;  %v1658_v26 = vadd.f32 %v1657_v24, %v1656_v23  ;;  %v1659_v27 = vpop.f32.mrb[14].mxu0 }
 0x151   : > { %v1660_v29 = vpop.f32.mrb[15].mxu0 }
 0x152   : > { %1588 = vst [vmem:[%s1939_s13] sm:$0xff] %v1587_v25   ;;  %v1128_v30 = vadd.f32 %v1710_v43, %v1658_v26  ;;  %v1661_v0 = vadd.f32 %v1660_v29, %v1659_v27 }
 0x154   : > { %v1131_v28 = vadd.f32 %v1711_v17, %v1661_v0  ;;  %v1143_v31 = vadd.f32 %v1542_v18, %v1128_v30  ;;  %1220 = sbr.rel (!%p1910_p3) target bundleno = 347 (0x15b), region = 112 }
 0x156   : > { %v1144_v32 = vadd.f32 %v1542_v18, %v1131_v28 }
 0x158   : > { %v1592_v33 = vpack.c.bf16 %v1144_v32, %v1143_v31 }
 0x15a   : > { %1595 = vst [vmem:[%s1939_s13 + $0x8] sm:$0xff] %v1592_v33  }
 0x15b PF: > { %1278 = sbr.rel (!%p1918_p7) target bundleno = 355 (0x163), region = 153  ;;  %s1573_s10 = sshll.u32 (%p1918_p7), %s1896_s26, 3  ;;  %v1297_v37 = vld [vmem:[%s1939_s13] sm:$0xff] (%p1918_p7)  }
 0x15c   : > { %s1281_s8 = scalar_lea.vmem (%p1918_p7), %s2205_s5, %s1573_s10 }
 0x15d   : > { %1298 = vst [vmem:[%s1281_s8] sm:$0xff] (%p1918_p7), %v1297_v37  }
 0x161   : > { %v1301_v38 = vld [vmem:[%s1939_s13 + $0x8] sm:$0xff] (%p1918_p7)  }
 0x162   : > { %1302 = vst [vmem:[%s1281_s8 + $0x18] sm:$0xff] %v1301_v38  }
 0x163 PF: > { %p14_p1 = scmp.ge.s32.totalorder %s1898_s27, 5   ;;  %s2209_s21 = smov %s1828_s22 }
 0x164   : > { %s2210_s22 = smov %s1916_s11  ;;  %s2211_s23 = smov %s1836_s24 }
 0x165   : > { %s2212_s24 = smov %s1908_s9  ;;  %s2213_s25 = smov %s1898_s27 }
 0x166   :  { %16 = sbr.rel (!%p14_p1) target bundleno = 3 (0x3), region = 266 }
 0x16d   :  { %1362 = vsyncmov [#allocation3] }
 0x170   :  { %s1363_s26 = vpop.sfrf %1362 }
 0x171   :  { %p1558_p2 = scmp.ne.s32.totalorder %s1363_s26, 0 }
 0x173   :  { %1367 = shalt.err (%p1558_p2)  }
 0x174   :  { %1369 = vsyncmov [#allocation3 + $0x1] }
 0x177   :  { %s1370_s12 = vpop.sfrf %1369 }
 0x178   :  { %p1559_p3 = scmp.ne.s32.totalorder %s1370_s12, 0 }
 0x17a   :  { %1374 = shalt.err (%p1559_p3)  }

</bundles_post_ra>
